<compile_context>
chip_gen: v5e
topology: v5e:2x2
jax: 0.10.0
libtpu: 0.0.40
codegen_flags: <defaults>
</compile_context>

<pallas_src>
import functools

import jax
import jax.numpy as jnp
import numpy as np
from jax import lax
from jax.experimental import pallas as pl
from jax.experimental.pallas import tpu as pltpu


# ---------------- host-side one-time flattened-GEMM precompute ---------------

def _refl(p, n):
    """ReflectionPad2d(1): padded index p in [0, n+2) -> source index in [0, n)."""
    assert n >= 2, "reflect pad=1 needs spatial dim >= 2"
    if p == 0:
        return 1
    if p == n + 1:
        return n - 2
    return p - 1


def _conv4s2_flat(wt, b, hin, win):
    """Conv2d(4x4, stride 2) after ReflectionPad2d(1) as a dense matrix on
    NCHW-flat activations: y_flat = x_flat @ M + bias (output NCHW-flat)."""
    cout, cin, kh_, kw_ = wt.shape
    assert (kh_, kw_) == (4, 4)
    assert hin % 2 == 0 and win % 2 == 0 and hin >= 2 and win >= 2
    ho, wo = hin // 2, win // 2
    M = np.zeros((cin * hin * win, cout * ho * wo), np.float32)
    for co in range(cout):
        for oy in range(ho):
            for ox in range(wo):
                oidx = (co * ho + oy) * wo + ox
                for ci in range(cin):
                    for ky in range(4):
                        iy = _refl(2 * oy + ky, hin)
                        for kx in range(4):
                            ix = _refl(2 * ox + kx, win)
                            # += merges reflect-pad column/row collisions.
                            M[(ci * hin + iy) * win + ix, oidx] += float(wt[co, ci, ky, kx])
    bias = np.repeat(np.asarray(b, np.float32), ho * wo)
    return M, bias


def _conv1x1_flat(wt, b, hin, win):
    """Final 1x1 conv as a (Cin*H*W, Cout*H*W) block-diagonal matrix (NCHW-flat)."""
    cout, cin = wt.shape[0], wt.shape[1]
    hw = hin * win
    M = np.zeros((cin * hw, cout * hw), np.float32)
    for co in range(cout):
        for ci in range(cin):
            for p in range(hw):
                M[ci * hw + p, co * hw + p] = float(wt[co, ci, 0, 0])
    bias = np.repeat(np.asarray(b, np.float32), hw)
    return M, bias


def _avgpool_flat(c, hin, win):
    """AvgPool2d(3, stride=2, pad=1, count_include_pad=False) on NCHW-flat."""
    assert hin % 2 == 0 and win % 2 == 0
    ho, wo = hin // 2, win // 2
    P = np.zeros((c * hin * win, c * ho * wo), np.float32)
    for oy in range(ho):
        rows = [r for r in (2 * oy - 1, 2 * oy, 2 * oy + 1) if 0 <= r < hin]
        for ox in range(wo):
            cols = [q for q in (2 * ox - 1, 2 * ox, 2 * ox + 1) if 0 <= q < win]
            v = 1.0 / (len(rows) * len(cols))
            for ch in range(c):
                for r in rows:
                    for q in cols:
                        P[(ch * hin + r) * win + q, (ch * ho + oy) * wo + ox] = v
    return P


def _ceil128(n):
    return ((n + 127) // 128) * 128


def prepare_operands(params, input_dim, H, W, n_layer, num_scales):
    """torch-layout params -> per-layer stacked, lane-dense GEMM operands.

    Returns (w_stacks, b_stacks, out_hw):
      w_stacks[l]: (num_scales, K_l, N_l)   dense flattened conv matrix
      b_stacks[l]: (num_scales, 1,  N_l)    flat bias row
    The cumulative avg-pool feeding scale s is fused into that scale's first
    matrix, so every scale consumes the same NCHW-flat input of width C*H*W.
    Per-scale matrices are zero-padded to common widths (multiples of 128);
    padded activation columns stay exactly 0 through lrelu, so padding is exact.
    """
    per_scale, out_hw = [], []
    cum_pool = None
    hs, ws = H, W
    for s in range(num_scales):
        layers = params[s]
        mats = []
        h, w = hs, ws
        for l in range(n_layer):
            wl, bl = np.asarray(layers[l][0]), np.asarray(layers[l][1])
            M, bias = _conv4s2_flat(wl, bl, h, w)
            if l == 0 and cum_pool is not None:
                M = (cum_pool @ M).astype(np.float32)     # fuse pool chain
            mats.append((M, bias))
            h, w = h // 2, w // 2
        wf, bf = np.asarray(layers[-1][0]), np.asarray(layers[-1][1])
        Mf, biasf = _conv1x1_flat(wf, bf, h, w)
        if n_layer == 0 and cum_pool is not None:
            Mf = (cum_pool @ Mf).astype(np.float32)
        mats.append((Mf, biasf))
        per_scale.append(mats)
        out_hw.append((h, w))
        if s + 1 < num_scales:
            P = _avgpool_flat(input_dim, hs, ws)
            cum_pool = P if cum_pool is None else (cum_pool @ P).astype(np.float32)
            hs, ws = hs // 2, ws // 2

    n_stage = n_layer + 1
    widths = [_ceil128(max(per_scale[s][l][0].shape[1] for s in range(num_scales)))
              for l in range(n_stage)]
    k0 = input_dim * H * W
    w_stacks, b_stacks = [], []
    for l in range(n_stage):
        K = k0 if l == 0 else widths[l - 1]
        Nl = widths[l]
        Wst = np.zeros((num_scales, K, Nl), np.float32)
        Bst = np.zeros((num_scales, 1, Nl), np.float32)
        for s in range(num_scales):
            M, bias = per_scale[s][l]
            Wst[s, :M.shape[0], :M.shape[1]] = M
            Bst[s, 0, :bias.shape[0]] = bias
        w_stacks.append(jnp.asarray(Wst))
        b_stacks.append(jnp.asarray(Bst))
    return tuple(w_stacks), tuple(b_stacks), tuple(out_hw)


# --------------------------------- kernel ------------------------------------

def _make_kernel(n_layer):
    """One grid step = one scale of the discriminator, batch folded into M."""
    def kernel(*refs):
        x_ref, o_ref = refs[0], refs[-1]
        h = x_ref[...]                                   # (N, C*H*W) f32
        for l in range(n_layer + 1):
            w_ref = refs[1 + 2 * l]
            b_ref = refs[2 + 2 * l]
            h = jnp.dot(h, w_ref[0],
                        preferred_element_type=jnp.float32) + b_ref[0]
            if l < n_layer:                              # LeakyReLU(0.2)
                h = jnp.maximum(h, jnp.float32(0.2) * h)
        o_ref[0] = h.astype(o_ref.dtype)                 # lane-dense (N, 128)
    return kernel


@functools.partial(jax.jit, static_argnames=("out_hw", "n_layer", "num_scales"))
def ms_image_dis_forward(x_nchw, w_stacks, b_stacks, *, out_hw, n_layer, num_scales):
    """Forward of MsImageDis: list of per-scale patch logits, NCHW like PyTorch."""
    N, cin, H, W = x_nchw.shape
    k0 = cin * H * W
    x_flat = x_nchw.reshape(N, k0)                       # pure view, no transpose

    in_specs = [pl.BlockSpec((N, k0), lambda s: (0, 0))]
    operands = [x_flat]
    for wst, bst in zip(w_stacks, b_stacks):
        in_specs.append(pl.BlockSpec((1,) + wst.shape[1:], lambda s: (s, 0, 0)))
        in_specs.append(pl.BlockSpec((1,) + bst.shape[1:], lambda s: (s, 0, 0)))
        operands += [wst, bst]

    out_width = w_stacks[-1].shape[-1]                   # padded to 128 multiple
    packed = pl.pallas_call(
        _make_kernel(n_layer),
        out_shape=jax.ShapeDtypeStruct((num_scales, N, out_width), jnp.float32),
        grid_spec=pltpu.PrefetchScalarGridSpec(
            num_scalar_prefetch=0,
            grid=(num_scales,),
            in_specs=in_specs,
            out_specs=pl.BlockSpec((1, N, out_width), lambda s: (s, 0, 0)),
        ),
        compiler_params=pltpu.CompilerParams(
            dimension_semantics=("parallel",)),          # 2 TCs on v7x
    )(*operands)

    outs = []
    for s, (ho, wo) in enumerate(out_hw):
        outs.append(packed[s, :, :ho * wo].reshape(N, 1, ho, wo))
    return outs
    # TODO(synk): calc_dis_loss / calc_gen_loss (lsgan) are trivial means over
    # these outputs and are out of scope for the forward-pass kernel.


# ------------------------------ synthetic params -----------------------------

def make_params(key, input_dim, dim, n_layer, num_scales):
    """Deterministic synthetic weights, torch conv layout (Cout, Cin, K, K)."""
    params = []
    for _ in range(num_scales):
        layers = []
        cin, cout = input_dim, dim
        for _ in range(n_layer):
            key, k1, k2 = jax.random.split(key, 3)
            w = jax.random.normal(k1, (cout, cin, 4, 4), jnp.float32) * 0.1
            b = jax.random.normal(k2, (cout,), jnp.float32) * 0.1
            layers.append((w, b))
            cin, cout = cout, cout * 2
        key, k1, k2 = jax.random.split(key, 3)
        w = jax.random.normal(k1, (1, cin, 1, 1), jnp.float32) * 0.1
        b = jax.random.normal(k2, (1,), jnp.float32) * 0.1
        layers.append((w, b))
        params.append(layers)
    return params


# ---------------------------- plain-JAX reference ----------------------------

def _ref_conv(x, w, b, stride, padding, pad_mode):
    if padding > 0:
        x = jnp.pad(x, ((0, 0), (padding, padding), (padding, padding), (0, 0)),
                    mode=pad_mode)
    wh = jnp.transpose(w, (2, 3, 1, 0))  # HWIO
    y = lax.conv_general_dilated(x, wh, (stride, stride), "VALID",
                                 dimension_numbers=("NHWC", "HWIO", "NHWC"))
    return y + b


def _ref_avgpool(x):
    pads = [(0, 0), (1, 1), (1, 1), (0, 0)]
    s = lax.reduce_window(x, jnp.float32(0), lax.add, (1, 3, 3, 1), (1, 2, 2, 1), pads)
    c = lax.reduce_window(jnp.ones_like(x[..., :1]), jnp.float32(0), lax.add,
                          (1, 3, 3, 1), (1, 2, 2, 1), pads)
    return s / c


def ref_forward(x_nchw, params):
    x = jnp.transpose(x_nchw, (0, 2, 3, 1))
    outs = []
    for layers in params:
        h = x
        for (w, b) in layers[:-1]:
            h = _ref_conv(h, w, b, 2, 1, "reflect")
            h = jnp.where(h >= 0, h, 0.2 * h)
        w, b = layers[-1]
        h = _ref_conv(h, w, b, 1, 0, "reflect")
        outs.append(jnp.transpose(h, (0, 3, 1, 2)))
        x = _ref_avgpool(x)
    return outs


# ------------------------------------ main -----------------------------------

if __name__ == "__main__":
    # MsImageDis(input_dim=3, params={'n_layer':2,'dim':8,'norm':'none',
    #   'activ':'lrelu','num_scales':2,'pad_type':'reflect','gan_type':'lsgan'})
    input_dim, dim, n_layer, num_scales = 3, 8, 2, 2
    N, H, W = 2, 16, 16

    key = jax.random.PRNGKey(0)
    kx, kp = jax.random.split(key)
    x = jax.random.normal(kx, (N, input_dim, H, W), jnp.float32)
    params = make_params(kp, input_dim, dim, n_layer, num_scales)

    # One-time host-side weight re-layout (outside the traced forward).
    w_stacks, b_stacks, out_hw = prepare_operands(
        params, input_dim, H, W, n_layer, num_scales)

    outs = ms_image_dis_forward(x, w_stacks, b_stacks,
                                out_hw=out_hw, n_layer=n_layer,
                                num_scales=num_scales)
    outs = [jax.block_until_ready(o) for o in outs]

    # sanity: shapes follow the PyTorch module exactly
    expected_shapes = [(N, 1, H // (2 ** (n_layer + s)), W // (2 ** (n_layer + s)))
                       for s in range(num_scales)]
    assert [tuple(o.shape) for o in outs] == expected_shapes, \
        [tuple(o.shape) for o in outs]

    # numerical check vs plain-JAX reference (lax.conv / reduce_window)
    refs = ref_forward(x, params)
    for o, r in zip(outs, refs):
        np.testing.assert_allclose(np.asarray(o), np.asarray(r),
                                   rtol=1e-3, atol=1e-3)

    print("KERNEL_OK")
</pallas_src>

<mosaic_0001>
module attributes {stable_mosaic.version = 11 : i64} {
  func.func @kernel(%arg0: i32, %arg1: memref<2x768xf32, #tpu.memory_space<vmem>>, %arg2: memref<1x768x512xf32, #tpu.memory_space<vmem>>, %arg3: memref<1x1x512xf32, #tpu.memory_space<vmem>>, %arg4: memref<1x512x256xf32, #tpu.memory_space<vmem>>, %arg5: memref<1x1x256xf32, #tpu.memory_space<vmem>>, %arg6: memref<1x256x128xf32, #tpu.memory_space<vmem>>, %arg7: memref<1x1x128xf32, #tpu.memory_space<vmem>>, %arg8: memref<1x2x128xf32, #tpu.memory_space<vmem>>) attributes {dimension_semantics = [#tpu.dimension_semantics<parallel>], iteration_bounds = array<i64: 2>, scalar_prefetch = 0 : i64, scratch_operands = 0 : i64, tpu.core_type = #tpu.core_type<tc>, window_params = [{pipeline_mode = #tpu.pipeline_mode<synchronous>, transform_indices = @transform_0, window_bounds = array<i64: 2, 768>}, {transform_indices = @transform_1, window_bounds = array<i64: 1, 768, 512>}, {transform_indices = @transform_2, window_bounds = array<i64: 1, 1, 512>}, {transform_indices = @transform_3, window_bounds = array<i64: 1, 512, 256>}, {transform_indices = @transform_4, window_bounds = array<i64: 1, 1, 256>}, {transform_indices = @transform_5, window_bounds = array<i64: 1, 256, 128>}, {transform_indices = @transform_6, window_bounds = array<i64: 1, 1, 128>}, {transform_indices = @transform_7, window_bounds = array<i64: 1, 2, 128>}]} {
    %c0 = arith.constant 0 : index
    %c0_0 = arith.constant 0 : index
    %0 = vector.load %arg1[%c0, %c0_0] : memref<2x768xf32, #tpu.memory_space<vmem>>, vector<2x768xf32>
    %c0_1 = arith.constant 0 : index
    %c0_2 = arith.constant 0 : index
    %c0_3 = arith.constant 0 : index
    %1 = vector.load %arg2[%c0_1, %c0_2, %c0_3] : memref<1x768x512xf32, #tpu.memory_space<vmem>>, vector<1x768x512xf32>
    %2 = vector.shape_cast %1 : vector<1x768x512xf32> to vector<768x512xf32>
    %cst = arith.constant dense<0.000000e+00> : vector<2x512xf32>
    %3 = tpu.matmul %0, %2, %cst {dimension_numbers = #tpu.dot_dimension_numbers<[1], [0], [0], [1], [0, 0, 1, 1], [], []>} : vector<2x768xf32>, vector<768x512xf32>, vector<2x512xf32> -> vector<2x512xf32>
    %c0_4 = arith.constant 0 : index
    %c0_5 = arith.constant 0 : index
    %c0_6 = arith.constant 0 : index
    %4 = vector.load %arg3[%c0_4, %c0_5, %c0_6] : memref<1x1x512xf32, #tpu.memory_space<vmem>>, vector<1x1x512xf32>
    %5 = vector.shape_cast %4 : vector<1x1x512xf32> to vector<1x512xf32>
    %6 = vector.broadcast %5 : vector<1x512xf32> to vector<2x512xf32>
    %7 = arith.addf %3, %6 : vector<2x512xf32>
    %cst_7 = arith.constant 2.000000e-01 : f32
    %8 = vector.broadcast %cst_7 : f32 to vector<2x512xf32>
    %9 = arith.mulf %8, %7 : vector<2x512xf32>
    %10 = arith.maximumf %7, %9 : vector<2x512xf32>
    %c0_8 = arith.constant 0 : index
    %c0_9 = arith.constant 0 : index
    %c0_10 = arith.constant 0 : index
    %11 = vector.load %arg4[%c0_8, %c0_9, %c0_10] : memref<1x512x256xf32, #tpu.memory_space<vmem>>, vector<1x512x256xf32>
    %12 = vector.shape_cast %11 : vector<1x512x256xf32> to vector<512x256xf32>
    %cst_11 = arith.constant dense<0.000000e+00> : vector<2x256xf32>
    %13 = tpu.matmul %10, %12, %cst_11 {dimension_numbers = #tpu.dot_dimension_numbers<[1], [0], [0], [1], [0, 0, 1, 1], [], []>} : vector<2x512xf32>, vector<512x256xf32>, vector<2x256xf32> -> vector<2x256xf32>
    %c0_12 = arith.constant 0 : index
    %c0_13 = arith.constant 0 : index
    %c0_14 = arith.constant 0 : index
    %14 = vector.load %arg5[%c0_12, %c0_13, %c0_14] : memref<1x1x256xf32, #tpu.memory_space<vmem>>, vector<1x1x256xf32>
    %15 = vector.shape_cast %14 : vector<1x1x256xf32> to vector<1x256xf32>
    %16 = vector.broadcast %15 : vector<1x256xf32> to vector<2x256xf32>
    %17 = arith.addf %13, %16 : vector<2x256xf32>
    %cst_15 = arith.constant 2.000000e-01 : f32
    %18 = vector.broadcast %cst_15 : f32 to vector<2x256xf32>
    %19 = arith.mulf %18, %17 : vector<2x256xf32>
    %20 = arith.maximumf %17, %19 : vector<2x256xf32>
    %c0_16 = arith.constant 0 : index
    %c0_17 = arith.constant 0 : index
    %c0_18 = arith.constant 0 : index
    %21 = vector.load %arg6[%c0_16, %c0_17, %c0_18] : memref<1x256x128xf32, #tpu.memory_space<vmem>>, vector<1x256x128xf32>
    %22 = vector.shape_cast %21 : vector<1x256x128xf32> to vector<256x128xf32>
    %cst_19 = arith.constant dense<0.000000e+00> : vector<2x128xf32>
    %23 = tpu.matmul %20, %22, %cst_19 {dimension_numbers = #tpu.dot_dimension_numbers<[1], [0], [0], [1], [0, 0, 1, 1], [], []>} : vector<2x256xf32>, vector<256x128xf32>, vector<2x128xf32> -> vector<2x128xf32>
    %c0_20 = arith.constant 0 : index
    %c0_21 = arith.constant 0 : index
    %c0_22 = arith.constant 0 : index
    %24 = vector.load %arg7[%c0_20, %c0_21, %c0_22] : memref<1x1x128xf32, #tpu.memory_space<vmem>>, vector<1x1x128xf32>
    %25 = vector.shape_cast %24 : vector<1x1x128xf32> to vector<1x128xf32>
    %26 = vector.broadcast %25 : vector<1x128xf32> to vector<2x128xf32>
    %27 = arith.addf %23, %26 : vector<2x128xf32>
    %c0_23 = arith.constant 0 : index
    %c0_24 = arith.constant 0 : index
    %c0_25 = arith.constant 0 : index
    %28 = vector.load %arg8[%c0_23, %c0_24, %c0_25] : memref<1x2x128xf32, #tpu.memory_space<vmem>>, vector<1x2x128xf32>
    %29 = vector.shape_cast %28 : vector<1x2x128xf32> to vector<2x128xf32>
    %30 = vector.shape_cast %27 : vector<2x128xf32> to vector<1x2x128xf32>
    tpu.vector_store %arg8[%c0_23, %c0_24, %c0_25], %30 {strides = array<i32>} : memref<1x2x128xf32, #tpu.memory_space<vmem>>, vector<1x2x128xf32>,
    return
  }
  func.func @transform_0(%arg0: i32) -> (i32, i32) {
    %c0_i32 = arith.constant 0 : i32
    %c0_i32_0 = arith.constant 0 : i32
    %c0_i32_1 = arith.constant 0 : i32
    return %c0_i32, %c0_i32_0 : i32, i32
  }
  func.func @transform_1(%arg0: i32) -> (i32, i32, i32) {
    %c0_i32 = arith.constant 0 : i32
    %c0_i32_0 = arith.constant 0 : i32
    %c0_i32_1 = arith.constant 0 : i32
    return %arg0, %c0_i32, %c0_i32_0 : i32, i32, i32
  }
  func.func @transform_2(%arg0: i32) -> (i32, i32, i32) {
    %c0_i32 = arith.constant 0 : i32
    %c0_i32_0 = arith.constant 0 : i32
    %c0_i32_1 = arith.constant 0 : i32
    return %arg0, %c0_i32, %c0_i32_0 : i32, i32, i32
  }
  func.func @transform_3(%arg0: i32) -> (i32, i32, i32) {
    %c0_i32 = arith.constant 0 : i32
    %c0_i32_0 = arith.constant 0 : i32
    %c0_i32_1 = arith.constant 0 : i32
    return %arg0, %c0_i32, %c0_i32_0 : i32, i32, i32
  }
  func.func @transform_4(%arg0: i32) -> (i32, i32, i32) {
    %c0_i32 = arith.constant 0 : i32
    %c0_i32_0 = arith.constant 0 : i32
    %c0_i32_1 = arith.constant 0 : i32
    return %arg0, %c0_i32, %c0_i32_0 : i32, i32, i32
  }
  func.func @transform_5(%arg0: i32) -> (i32, i32, i32) {
    %c0_i32 = arith.constant 0 : i32
    %c0_i32_0 = arith.constant 0 : i32
    %c0_i32_1 = arith.constant 0 : i32
    return %arg0, %c0_i32, %c0_i32_0 : i32, i32, i32
  }
  func.func @transform_6(%arg0: i32) -> (i32, i32, i32) {
    %c0_i32 = arith.constant 0 : i32
    %c0_i32_0 = arith.constant 0 : i32
    %c0_i32_1 = arith.constant 0 : i32
    return %arg0, %c0_i32, %c0_i32_0 : i32, i32, i32
  }
  func.func @transform_7(%arg0: i32) -> (i32, i32, i32) {
    %c0_i32 = arith.constant 0 : i32
    %c0_i32_0 = arith.constant 0 : i32
    %c0_i32_1 = arith.constant 0 : i32
    return %arg0, %c0_i32, %c0_i32_0 : i32, i32, i32
  }
}

</mosaic_0001>

<bundles_post_ra>
// kernel: squeeze.3
= control target key start
LH: loop header
LB: loop body
LE: loop exit
PB: predicated region body
PF: predicated region fallthrough
CT: control target
= control target key end

     0   :  { %s86_s0 = inlined_call_operand.vmem [shape: f32[1,2,4], index: 0, kind: input, shape index: {}]   ;;  %s87_s1 = inlined_call_operand.hbm [shape: f32[2,1,2,2], index: 1, kind: output, shape index: {}]  }
   0x1   :  { %v5_v0 = vld [vmem:[%s86_s0] sm:$0x3] }
   0x2   :  { %2 = vsyncpa [#allocation1], 0  ;;  %6 = vst [vmem:[#allocation3] sm:$0x3] %v5_v0  ;;  %vm8_vm0 = vcmask 15360   ;;  %s68_s0 = smov 126  }
   0x3   :  { %s69_s8 = smov [#allocation0]   ;;  %s33_s1 = sshll.u32 %s87_s1, 4  ;;  %s34_s1 = int_to_ptr.hbm [resolvable:$true] %s33_s1 }
   0x4   :  { %s31_s9 = sshll.u32 %s69_s8, 4  ;;  %s32_s9 = int_to_ptr.vmem [resolvable:$true] %s31_s9 }
   0x9   :  { %v10_v1 = vld [vmem:[#allocation3] sm:$0x3]  }
   0xa   :  { %v7_v2 = vld [vmem:[#allocation3] sm:$0x3]   ;;  %11 = vrot.lane.b32.xlu0 %v10_v1, %s68_s0 }
   0xb   :  { %9 = vst.msk [vmem:[#allocation2] ss:$8 sm:$0x3] %vm8_vm0, %v7_v2  }
  0x7c   :  { %v12_v3 = vpop.permute.xlu0 %11  }
  0x7d   :  { %15 = vst.msk [vmem:[#allocation2 + $0x1] ss:$8 sm:$0x3] %vm8_vm0, %v12_v3  }
  0x84   :  { %v18_v4 = vld [vmem:[#allocation2] sm:$0x3]  ;;  %v23_v5 = vld [vmem:[#allocation2 + $0x8] sm:$0x3] }
  0x85   :  { %21 = vst [vmem:[#allocation0] sm:$0x3] %v18_v4 }
  0x86   :  { %27 = vst [vmem:[#allocation0 + $0x2] sm:$0x3] %v23_v5 }
  0x87   :  { %36 = dma.vmem_to_hbm [thread:$0]  %s32_s9, 64, %s34_s1, [#allocation1]  }
  0x88   :  { %66 = dma.done.wait [#allocation1], 64  }
  0x89   :  { %67 = vsyncadd [#allocation1], 4294967232 }
  0x8a   :  { %39 = vsyncpa [#allocation1], 1 }

// kernel: squeeze.2
= control target key start
LH: loop header
LB: loop body
LE: loop exit
PB: predicated region body
PF: predicated region fallthrough
CT: control target
= control target key end

     0   :  { %s102_s0 = inlined_call_operand.vmem [shape: f32[1,2,16], index: 0, kind: input, shape index: {}]   ;;  %s103_s1 = inlined_call_operand.hbm [shape: f32[2,1,4,4], index: 1, kind: output, shape index: {}]  }
   0x1   :  { %v5_v0 = vld [vmem:[%s102_s0] sm:$0x3] }
   0x2   :  { %6 = vst [vmem:[#allocation3] sm:$0x3] %v5_v0 }
   0x3   :  { %2 = vsyncpa [#allocation1], 0  ;;  %s82_s0 = smov 124   ;;  %s83_s8 = smov 116   ;;  %vm8_vm0 = vcmask 31744  }
   0x4   :  { %s84_s9 = smov 120   ;;  %s85_s10 = smov [#allocation0]  }
   0x5   :  { %s43_s11 = sshll.u32 %s85_s10, 4  ;;  %s45_s1 = sshll.u32 %s103_s1, 4  ;;  %s44_s11 = int_to_ptr.vmem [resolvable:$true] %s43_s11  ;;  %s46_s1 = int_to_ptr.hbm [resolvable:$true] %s45_s1 }
   0x9   :  { %v10_v1 = vld [vmem:[#allocation3] sm:$0x3]  }
   0xa   :  { %v22_v2 = vld [vmem:[#allocation3] sm:$0x3]   ;;  %11 = vrot.lane.b32.xlu0 %v10_v1, %s82_s0 }
   0xb   :  { %23 = vrot.lane.b32.xlu1 %v22_v2, %s83_s8  ;;  %v16_v3 = vld [vmem:[#allocation3] sm:$0x3]  }
   0xc   :  { %v7_v4 = vld [vmem:[#allocation3] sm:$0x3]  }
   0xd   :  { %9 = vst.msk [vmem:[#allocation2] ss:$8 sm:$0x3] %vm8_vm0, %v7_v4  }
  0x12   :  { %17 = vrot.lane.b32.xlu0 %v16_v3, %s84_s9 }
  0x7c   :  { %v12_v5 = vpop.permute.xlu0 %11  }
  0x7d   :  { %v24_v6 = vpop.permute.xlu1 %23   ;;  %15 = vst.msk [vmem:[#allocation2 + $0x1] ss:$8 sm:$0x3] %vm8_vm0, %v12_v5  }
  0x7e   :  { %27 = vst.msk [vmem:[#allocation2 + $0x3] ss:$8 sm:$0x3] %vm8_vm0, %v24_v6  }
  0x84   :  { %v18_v7 = vpop.permute.xlu0 %17  }
  0x85   :  { %21 = vst.msk [vmem:[#allocation2 + $0x2] ss:$8 sm:$0x3] %vm8_vm0, %v18_v7  }
  0x8c   :  { %v30_v8 = vld [vmem:[#allocation2] sm:$0xf]  ;;  %v35_v9 = vld [vmem:[#allocation2 + $0x8] sm:$0xf] }
  0x8d   :  { %33 = vst [vmem:[#allocation0] sm:$0xf] %v30_v8 }
  0x8e   :  { %39 = vst [vmem:[#allocation0 + $0x4] sm:$0xf] %v35_v9 }
  0x8f   :  { %48 = dma.vmem_to_hbm [thread:$0]  %s44_s11, 128, %s46_s1, [#allocation1]  }
  0x90   :  { %80 = dma.done.wait [#allocation1], 128  }
  0x91   :  { %81 = vsyncadd [#allocation1], 4294967168 }
  0x92   :  { %51 = vsyncpa [#allocation1], 1 }

// kernel: ms_image_dis_forward.1
= control target key start
LH: loop header
LB: loop body
LE: loop exit
PB: predicated region body
PF: predicated region fallthrough
CT: control target
= control target key end

     0   :  { %s3138_s0 = inlined_call_operand.vmem [shape: f32[2,768], index: 0, kind: input, shape index: {}]   ;;  %s3139_s1 = inlined_call_operand.hbm [shape: f32[2,768,512], index: 1, kind: input, shape index: {}]   ;;  %s3140_s2 = inlined_call_operand.hbm [shape: f32[2,1,512], index: 2, kind: input, shape index: {}]   ;;  %s3141_s3 = inlined_call_operand.hbm [shape: f32[2,512,256], index: 3, kind: input, shape index: {}]   ;;  %s3142_s4 = inlined_call_operand.hbm [shape: f32[2,1,256], index: 4, kind: input, shape index: {}]   ;;  %s3143_s5 = inlined_call_operand.hbm [shape: f32[2,256,128], index: 5, kind: input, shape index: {}]   ;;  %s3144_s6 = inlined_call_operand.hbm [shape: f32[2,1,128], index: 6, kind: input, shape index: {}]   ;;  %s3145_s7 = inlined_call_operand.vmem [shape: f32[2,2,128], index: 7, kind: output, shape index: {}]  }
   0x1   :  { %3149 = sst [smem:[#allocation19_spill]] %s3139_s1 }
   0x2   :  { %3150 = sst [smem:[#allocation20_spill]] %s3140_s2 }
   0x3   :  { %3151 = sst [smem:[#allocation21_spill]] %s3142_s4 }
   0x4   :  { %3152 = sst [smem:[#allocation22_spill]] %s3145_s7 }
   0x5   :  { %12 = vsyncpa [#allocation3], 0 }
   0x6   :  { %14 = vsyncpa [#allocation3 + $0x1], 0 }
   0x7   :  { %15 = vsyncpa [#allocation5], 0 }
   0x8   :  { %17 = vsyncpa [#allocation5 + $0x1], 0 }
   0x9   :  { %18 = vsyncpa [#allocation8], 0 }
   0xa   :  { %20 = vsyncpa [#allocation8 + $0x1], 0 }
   0xb   :  { %21 = vsyncpa [#allocation11], 0 }
   0xc   :  { %23 = vsyncpa [#allocation11 + $0x1], 0  ;;  %s2312_s24 = smov 0   ;;  %s2314_s25 = smov 0  }
   0xd   :  { %s2316_s26 = smov 0   ;;  %s2318_s27 = smov 0  }
   0xe LB: > { %3153 = sst [smem:[#allocation16_spill]] %s2260_s26  ;;  %s2331_s28 = sadd.s32 4294967295, %s2264_s27   ;;  %s2264_s27 = sphi %s2318_s27, %s3164_s27   ;;  %s2260_s26 = sphi %s2316_s26, %s3166_s26   ;;  %s2256_s25 = sphi %s2314_s25, %s3168_s25   ;;  %s2252_s24 = sphi %s2312_s24, %s3167_s24  }
   0xf   : > { %s2334_s29 = sadd.s32 1, %s2264_s27   ;;  %s57_s8 = sadd.s32 1, %s2260_s26 }
  0x10   : > { %3154 = sst [smem:[#allocation17_spill]] %s2334_s29  ;;  %s54_s30 = ssub.s32 %s2264_s27, %s2334_s29 }
  0x11   : > { %p55_p0 = scmp.eq.s32.totalorder %s54_s30, 0  ;;  %p64_p1 = scmp.ne.s32.totalorder %s2260_s26, %s2256_s25 }
  0x12   : > { %p65_p2 = scmp.eq.s32.totalorder %s2264_s27, 0  ;;  %p70_p3 = scmp.ne.s32.totalorder %s2256_s25, %s2252_s24 }
  0x13   : > { %s2344_s9 = scalar_select %p55_p0, %s2260_s26, %s57_s8  }
  0x14   : > { %p66_p4 = por %p65_p2, %p64_p1  ;;  %p71_p5 = scmp.eq.s32.totalorder %s2331_s28, 0 }
  0x15   : > { %3155 = sst [smem:[#allocation18_spill]] %s2344_s9  ;;  %p1994_p6 = scmp.lt.s32.totalorder %s2264_s27, 2 }
  0x16   : > { %p2348_p7 = por %p71_p5, %p70_p3  ;;  %s2353_s11 = sand.u32 1, %s2260_s26  }
  0x17   : > { %p2355_p8 = pnand %p1994_p6, %p66_p4  ;;  %s275_s13 = sand.u32 1, %s2264_s27  }
  0x18   : > { %s1940_s14 = sshll.u32 %s2353_s11, 2  ;;  %s1941_s15 = sshll.u32 %s2264_s27, 2 }
  0x19   : > { %s279_s16 = scalar_lea.vmem [#allocation4], %s1940_s14  ;;  %s3158_s2 = sld [smem:[#allocation20_spill]] }
  0x1a   : > { %s287_s17 = sshll.u32 %s279_s16, 4  ;;  %p1950_p9 = scmp.ge.s32.totalorder %s2264_s27, 1  ;;  %s288_s17 = int_to_ptr.vmem [resolvable:$true] %s287_s17 }
  0x1b   : > { %p372_p10 = scmp.lt.s32.totalorder %s2264_s27, 3  ;;  %s2369_s22 = scalar_lea.sflag [#allocation5], %s275_s13 }
  0x1c   : > { %p2373_p12 = pneg %p2355_p8 }
  0x1f   : > { %s283_s20 = scalar_lea.hbm %s3158_s2, %s1941_s15  ;;  %s2045_s15 = scalar_lea.hbm %s3158_s2, 8 }
  0x20   : > { %s285_s21 = sshll.u32 %s283_s20, 4  ;;  %s286_s21 = int_to_ptr.hbm [resolvable:$true] %s285_s21 }
  0x21   : > { %s2038_s23 = sshra.s32 %s286_s21, 4  ;;  %s2039_s23 = int_to_ptr.hbm [resolvable:$true] %s2038_s23 }
  0x22   : > { %s2040_s24 = scalar_lea.hbm %s2039_s23, 4  ;;  %p2046_p1 = scmp.lt.s32.totalorder %s2039_s23, %s3158_s2 }
  0x23   : > { %p2041_p11 = scmp.ne.s32.totalorder %s2039_s23, %s2040_s24  ;;  %p2047_p2 = scmp.lt.s32.totalorder %s2045_s15, %s2040_s24 }
  0x25   : > { %p2043_p13 = pnand %p2373_p12, %p2041_p11  ;;  %p2048_p3 = por %p2047_p2, %p2046_p1 }
  0x27   : > { %p2044_p0 = pneg %p2043_p13 }
  0x29   : > { %p2049_p4 = pnand %p2048_p3, %p2044_p0 }
  0x2b   : > { %2052 = shalt.err (!%p2049_p4)
}
  0x2c   : > { %1981 = dma.hbm_to_vmem [thread:$0]  (!%p2355_p8), %s286_s21, 64, %s288_s17, %s2369_s22  }
  0x2d   : > { %p2392_p5 = pnand %p1950_p9, %p372_p10  ;;  %s1945_s20 = sshll.u32 %s2353_s11, 1 }
  0x2e   : > { %s1946_s23 = sshll.u32 %s2264_s27, 1  ;;  %s3161_s4 = sld [smem:[#allocation21_spill]] }
  0x2f   : > { %s320_s16 = scalar_lea.vmem [#allocation7], %s1945_s20  ;;  %s2403_s2 = scalar_lea.sflag [#allocation8], %s275_s13 }
  0x30   : > { %s328_s18 = sshll.u32 %s320_s16, 4  ;;  %s329_s18 = int_to_ptr.vmem [resolvable:$true] %s328_s18 }
  0x34   : > { %s324_s14 = scalar_lea.hbm %s3161_s4, %s1946_s23  ;;  %s2075_s24 = scalar_lea.hbm %s3161_s4, 4 }
  0x35   : > { %s326_s15 = sshll.u32 %s324_s14, 4  ;;  %s327_s15 = int_to_ptr.hbm [resolvable:$true] %s326_s15 }
  0x36   : > { %s2068_s17 = sshra.s32 %s327_s15, 4  ;;  %s2069_s17 = int_to_ptr.hbm [resolvable:$true] %s2068_s17 }
  0x37   : > { %s2070_s21 = scalar_lea.hbm %s2069_s17, 2  ;;  %p2076_p11 = scmp.lt.s32.totalorder %s2069_s17, %s3161_s4 }
  0x38   : > { %p2071_p6 = scmp.ne.s32.totalorder %s2069_s17, %s2070_s21  ;;  %p2077_p13 = scmp.lt.s32.totalorder %s2075_s24, %s2070_s21 }
  0x3a   : > { %p2073_p9 = pnand %p2071_p6, %p2373_p12  ;;  %p2078_p0 = por %p2077_p13, %p2076_p11 }
  0x3c   : > { %p2074_p10 = pneg %p2073_p9 }
  0x3e   : > { %p2079_p1 = pnand %p2078_p0, %p2074_p10 }
  0x40   : > { %2082 = shalt.err (!%p2079_p1)
}
  0x41   : > { %1987 = dma.hbm_to_vmem [thread:$0]  (!%p2355_p8), %s327_s15, 32, %s329_s18, %s2403_s2  }
  0x42   : > { %s1960_s13 = smul.u32 3072, %s2353_s11  ;;  %s3162_s1 = sld [smem:[#allocation19_spill]] }
  0x43   : > { %s1961_s26 = smul.u32 3072, %s2264_s27  ;;  %s1942_s24 = sshll.u32 %s2353_s11, 10 }
  0x44   : > { %s257_s16 = scalar_lea.vmem [#allocation2], %s1960_s13  ;;  %s254_s23 = scalar_lea.sflag [#allocation3], %s2353_s11 }
  0x45   : > { %s265_s17 = sshll.u32 %s257_s16, 4  ;;  %s266_s17 = int_to_ptr.vmem [resolvable:$true] %s265_s17 }
  0x48   : > { %s262_s14 = scalar_lea.hbm %s3162_s1, %s1961_s26  ;;  %s2105_s29 = scalar_lea.hbm %s3162_s1, 6144 }
  0x49   : > { %s263_s21 = sshll.u32 %s262_s14, 4  ;;  %s264_s21 = int_to_ptr.hbm [resolvable:$true] %s263_s21 }
  0x4a   : > { %s2098_s8 = sshra.s32 %s264_s21, 4  ;;  %s2099_s8 = int_to_ptr.hbm [resolvable:$true] %s2098_s8 }
  0x4b   : > { %s2100_s4 = scalar_lea.hbm %s2099_s8, 3072  ;;  %p2106_p6 = scmp.lt.s32.totalorder %s2099_s8, %s3162_s1 }
  0x4c   : > { %p2101_p2 = scmp.ne.s32.totalorder %s2099_s8, %s2100_s4  ;;  %p2107_p9 = scmp.lt.s32.totalorder %s2105_s29, %s2100_s4 }
  0x4e   : > { %p2103_p3 = pnand %p2101_p2, %p2373_p12  ;;  %p2108_p10 = por %p2107_p9, %p2106_p6 }
  0x50   : > { %p2104_p4 = pneg %p2103_p3 }
  0x52   : > { %p2109_p11 = pnand %p2108_p10, %p2104_p4 }
  0x54   : > { %2112 = shalt.err (!%p2109_p11)
}
  0x55   : > { %s2266_s13 = smov 512   ;;  %s2267_s20 = smov 32  }
  0x56   : > { %1978 = dma.hbm_to_vmem [thread:$0]  (!%p2355_p8), %s264_s21, 49152, %s266_s17, %s254_s23, %s2266_s13, %s2266_s13, %s2267_s20  }
  0x57   : > { %s1958_s14 = sshll.u32 %s2264_s27, 10  ;;  %s298_s7 = scalar_lea.vmem [#allocation6], %s1942_s24 }
  0x58   : > { %s303_s18 = scalar_lea.hbm %s3141_s3, %s1958_s14  ;;  %s306_s9 = sshll.u32 %s298_s7, 4  ;;  %s307_s9 = int_to_ptr.vmem [resolvable:$true] %s306_s9 }
  0x59   : > { %s304_s8 = sshll.u32 %s303_s18, 4  ;;  %s1947_s4 = sshll.u32 %s2353_s11, 8  ;;  %s305_s8 = int_to_ptr.hbm [resolvable:$true] %s304_s8 }
  0x5a   : > { %s2128_s29 = sshra.s32 %s305_s8, 4  ;;  %s2135_s21 = scalar_lea.hbm %s3141_s3, 2048  ;;  %s2129_s29 = int_to_ptr.hbm [resolvable:$true] %s2128_s29 }
  0x5b   : > { %s2130_s26 = scalar_lea.hbm %s2129_s29, 1024  ;;  %p2136_p2 = scmp.lt.s32.totalorder %s2129_s29, %s3141_s3 }
  0x5c   : > { %p2131_p13 = scmp.ne.s32.totalorder %s2129_s29, %s2130_s26  ;;  %p2137_p3 = scmp.lt.s32.totalorder %s2135_s21, %s2130_s26 }
  0x5e   : > { %p2133_p0 = pnand %p2131_p13, %p2373_p12  ;;  %p2138_p4 = por %p2137_p3, %p2136_p2 }
  0x60   : > { %p2134_p1 = pneg %p2133_p0 }
  0x62   : > { %p2139_p6 = pnand %p2138_p4, %p2134_p1 }
  0x64   : > { %2142 = shalt.err (!%p2139_p6)
}
  0x65   : > { %s2268_s7 = smov 256   ;;  %s2269_s24 = smov 16  }
  0x66   : > { %1984 = dma.hbm_to_vmem [thread:$0]  (!%p2355_p8), %s305_s8, 16384, %s307_s9, %s2369_s22, %s2268_s7, %s2268_s7, %s2269_s24  }
  0x67   : > { %s1959_s20 = sshll.u32 %s2264_s27, 8  ;;  %s339_s15 = scalar_lea.vmem [#allocation9], %s1947_s4 }
  0x68   : > { %s344_s16 = scalar_lea.hbm %s3143_s5, %s1959_s20  ;;  %s347_s18 = sshll.u32 %s339_s15, 4  ;;  %s348_s18 = int_to_ptr.vmem [resolvable:$true] %s347_s18 }
  0x69   : > { %s345_s29 = sshll.u32 %s344_s16, 4  ;;  %s2165_s22 = scalar_lea.hbm %s3143_s5, 512  ;;  %s346_s29 = int_to_ptr.hbm [resolvable:$true] %s345_s29 }
  0x6a   : > { %s2158_s26 = sshra.s32 %s346_s29, 4  ;;  %s2159_s26 = int_to_ptr.hbm [resolvable:$true] %s2158_s26 }
  0x6b   : > { %s2160_s17 = scalar_lea.hbm %s2159_s26, 256  ;;  %p2166_p13 = scmp.lt.s32.totalorder %s2159_s26, %s3143_s5 }
  0x6c   : > { %p2161_p9 = scmp.ne.s32.totalorder %s2159_s26, %s2160_s17  ;;  %p2167_p0 = scmp.lt.s32.totalorder %s2165_s22, %s2160_s17 }
  0x6e   : > { %p2163_p10 = pnand %p2161_p9, %p2373_p12  ;;  %p2168_p1 = por %p2167_p0, %p2166_p13 }
  0x70   : > { %p2164_p11 = pneg %p2163_p10 }
  0x72   : > { %p2169_p2 = pnand %p2168_p1, %p2164_p11 }
  0x74   : > { %2172 = shalt.err (!%p2169_p2)
}
  0x75   : > { %s2270_s4 = smov 128   ;;  %s2271_s13 = smov 8  }
  0x76   : > { %1990 = dma.hbm_to_vmem [thread:$0]  (!%p2355_p8), %s346_s29, 4096, %s348_s18, %s2403_s2, %s2270_s4, %s2270_s4, %s2271_s13  }
  0x77   : > { %s363_s20 = scalar_lea.hbm %s3144_s6, %s2264_s27  ;;  %s360_s1 = scalar_lea.vmem [#allocation10], %s2353_s11 }
  0x78   : > { %s365_s14 = sshll.u32 %s363_s20, 4  ;;  %s367_s16 = sshll.u32 %s360_s1, 4  ;;  %s366_s14 = int_to_ptr.hbm [resolvable:$true] %s365_s14  ;;  %s368_s16 = int_to_ptr.vmem [resolvable:$true] %s367_s16 }
  0x79   : > { %s358_s15 = scalar_lea.sflag [#allocation11], %s2353_s11  ;;  %s2188_s26 = sshra.s32 %s366_s14, 4  ;;  %s2189_s26 = int_to_ptr.hbm [resolvable:$true] %s2188_s26 }
  0x7a   : > { %s2190_s17 = scalar_lea.hbm %s2189_s26, 1  ;;  %s2195_s2 = scalar_lea.hbm %s3144_s6, 2 }
  0x7b   : > { %p2191_p3 = scmp.ne.s32.totalorder %s2189_s26, %s2190_s17  ;;  %p2196_p9 = scmp.lt.s32.totalorder %s2189_s26, %s3144_s6 }
  0x7c   : > { %p2197_p10 = scmp.lt.s32.totalorder %s2195_s2, %s2190_s17 }
  0x7d   : > { %p2193_p4 = pnand %p2191_p3, %p2373_p12 }
  0x7e   : > { %p2198_p11 = por %p2197_p10, %p2196_p9 }
  0x7f   : > { %p2194_p6 = pneg %p2193_p4 }
  0x81   : > { %p2199_p13 = pnand %p2198_p11, %p2194_p6 }
  0x83   : > { %2202 = shalt.err (!%p2199_p13)
}
  0x84   : > { %1993 = dma.hbm_to_vmem [thread:$0]  (!%p2355_p8), %s366_s14, 16, %s368_s16, %s358_s15  }
  0x85   : > { %376 = sbr.rel (%p2392_p5) target bundleno = 801 (0x321), region = 48  ;;  %s2483_s27 = sand.u32 (!%p2392_p5), 1, %s2256_s25  }
  0x86   : > { %s1962_s11 = smul.u32 (!%p2392_p5), 3072, %s2483_s27  ;;  %s379_s30 = scalar_lea.sflag (!%p2392_p5), [#allocation3], %s2483_s27 }
  0x88   : > { %s2487_s22 = scalar_lea.vmem (!%p2392_p5), [#allocation2], %s1962_s11 }
  0x8a   : > { %2235 = dma.done.wait (%p2348_p7), %s379_s30, 49152  }
  0x8b   : > { %2237 = vsyncadd (%p2348_p7), %s379_s30, 4294918144  ;;  %s388_s12 = sand.u32 1, %s2331_s28   ;;  %s1951_s19 = sshll.u32 %s2483_s27, 2 }
  0x8c   : > { %s389_s9 = scalar_lea.sflag [#allocation5], %s388_s12  ;;  %s2495_s8 = scalar_lea.vmem [#allocation4], %s1951_s19 }
  0x8d   : > { %2239 = dma.done.wait (%p2348_p7), %s389_s9, 16448  }
  0x8e   : > { %2241 = vsyncadd (%p2348_p7), %s389_s9, 4294950848  ;;  %s1952_s4 = sshll.u32 %s2483_s27, 10  ;;  %s1953_s13 = sshll.u32 %s2483_s27, 1 }
  0x8f   : > { %s2503_s7 = scalar_lea.vmem [#allocation6], %s1952_s4  ;;  %s409_s24 = scalar_lea.sflag [#allocation8], %s388_s12 }
  0x90   : > { %s2505_s20 = scalar_lea.vmem [#allocation7], %s1953_s13 }
  0x91   : > { %2243 = dma.done.wait (%p2348_p7), %s409_s24, 4128  }
  0x92   : > { %2245 = vsyncadd (%p2348_p7), %s409_s24, 4294963168  ;;  %s1954_s14 = sshll.u32 %s2483_s27, 8  ;;  %s429_s16 = scalar_lea.sflag [#allocation11], %s2483_s27 }
  0x93   : > { %s2512_s1 = scalar_lea.vmem [#allocation9], %s1954_s14  ;;  %s431_s15 = scalar_lea.vmem [#allocation10], %s2483_s27 }
  0x94   : > { %2247 = dma.done.wait (%p2348_p7), %s429_s16, 16  }
  0x95   : > { %2249 = vsyncadd (%p2348_p7), %s429_s16, 4294967280  ;;  %v552_v0 = vld [vmem:[%s2487_s22 + $0x1e0] sm:$0xff]  ;;  %p486_p7 = scmp.lt.s32.totalorder %s2331_s28, 1  ;;  %s3163_s29 = sld [smem:[#allocation22_spill]] }
  0x96   : > { %v616_v1 = vld [vmem:[%s2487_s22 + $0x3e0] sm:$0xff]  ;;  %903 = vmatpush.msra.mxu0 %v552_v0 }
  0x97   : > { %v680_v2 = vld [vmem:[%s2487_s22 + $0x5e0] sm:$0xff]  ;;  %923 = vmatpush.msra.mxu1 %v616_v1  ;;  %v553_v1 = vld [vmem:[%s2487_s22 + $0x1e8] sm:$0xff]  ;;  %s3170_s28 = smov (!%p486_p7, %s2331_s28), 1 }
  0x98   : > { %v548_v3 = vld [vmem:[%s2487_s22 + $0x1c0] sm:$0xff]  ;;  %943 = vmatpush.msra.mxu2 %v680_v2  ;;  %s1955_s23 = sshll.u32 %s3170_s28, 1 }
  0x99   : > { %v612_v4 = vld [vmem:[%s2487_s22 + $0x3c0] sm:$0xff]  ;;  %904 = vmatpush.msra.mxu0 %v548_v3 }
  0x9a   : > { %v676_v5 = vld [vmem:[%s2487_s22 + $0x5c0] sm:$0xff]  ;;  %924 = vmatpush.msra.mxu1 %v612_v4 }
  0x9b   : > { %v744_v6 = vld [vmem:[%s2487_s22 + $0x7e0] sm:$0xff]  ;;  %944 = vmatpush.msra.mxu2 %v676_v5  ;;  %v549_v5 = vld [vmem:[%s2487_s22 + $0x1c8] sm:$0xff]  ;;  %s489_s11 = scalar_lea.vmem %s3163_s29, %s1955_s23 }
  0x9c   : > { %v544_v7 = vld [vmem:[%s2487_s22 + $0x1a0] sm:$0xff]  ;;  %963 = vmatpush.msra.mxu3 %v744_v6  ;;  %v617_v6 = vld [vmem:[%s2487_s22 + $0x3e8] sm:$0xff] }
  0x9d   : > { %v608_v8 = vld [vmem:[%s2487_s22 + $0x3a0] sm:$0xff]  ;;  %905 = vmatpush.msra.mxu0 %v544_v7 }
  0x9e   : > { %v672_v9 = vld [vmem:[%s2487_s22 + $0x5a0] sm:$0xff]  ;;  %925 = vmatpush.msra.mxu1 %v608_v8 }
  0x9f   : > { %v740_v10 = vld [vmem:[%s2487_s22 + $0x7c0] sm:$0xff]  ;;  %945 = vmatpush.msra.mxu2 %v672_v9  ;;  %v545_v9 = vld [vmem:[%s2487_s22 + $0x1a8] sm:$0xff] }
  0xa0   : > { %v540_v11 = vld [vmem:[%s2487_s22 + $0x180] sm:$0xff]  ;;  %964 = vmatpush.msra.mxu3 %v740_v10  ;;  %v613_v10 = vld [vmem:[%s2487_s22 + $0x3c8] sm:$0xff] }
  0xa1   : > { %v604_v12 = vld [vmem:[%s2487_s22 + $0x380] sm:$0xff]  ;;  %906 = vmatpush.msra.mxu0 %v540_v11 }
  0xa2   : > { %v668_v13 = vld [vmem:[%s2487_s22 + $0x580] sm:$0xff]  ;;  %926 = vmatpush.msra.mxu1 %v604_v12 }
  0xa3   : > { %v736_v14 = vld [vmem:[%s2487_s22 + $0x7a0] sm:$0xff]  ;;  %946 = vmatpush.msra.mxu2 %v668_v13  ;;  %v541_v13 = vld [vmem:[%s2487_s22 + $0x188] sm:$0xff] }
  0xa4   : > { %v536_v15 = vld [vmem:[%s2487_s22 + $0x160] sm:$0xff]  ;;  %965 = vmatpush.msra.mxu3 %v736_v14  ;;  %v609_v14 = vld [vmem:[%s2487_s22 + $0x3a8] sm:$0xff] }
  0xa5   : > { %v600_v16 = vld [vmem:[%s2487_s22 + $0x360] sm:$0xff]  ;;  %907 = vmatpush.msra.mxu0 %v536_v15 }
  0xa6   : > { %v664_v17 = vld [vmem:[%s2487_s22 + $0x560] sm:$0xff]  ;;  %927 = vmatpush.msra.mxu1 %v600_v16 }
  0xa7   : > { %v732_v18 = vld [vmem:[%s2487_s22 + $0x780] sm:$0xff]  ;;  %947 = vmatpush.msra.mxu2 %v664_v17  ;;  %v537_v17 = vld [vmem:[%s2487_s22 + $0x168] sm:$0xff] }
  0xa8   : > { %v532_v19 = vld [vmem:[%s2487_s22 + $0x140] sm:$0xff]  ;;  %966 = vmatpush.msra.mxu3 %v732_v18  ;;  %v605_v18 = vld [vmem:[%s2487_s22 + $0x388] sm:$0xff] }
  0xa9   : > { %v596_v20 = vld [vmem:[%s2487_s22 + $0x340] sm:$0xff]  ;;  %908 = vmatpush.msra.mxu0 %v532_v19 }
  0xaa   : > { %v660_v21 = vld [vmem:[%s2487_s22 + $0x540] sm:$0xff]  ;;  %928 = vmatpush.msra.mxu1 %v596_v20 }
  0xab   : > { %v728_v22 = vld [vmem:[%s2487_s22 + $0x760] sm:$0xff]  ;;  %948 = vmatpush.msra.mxu2 %v660_v21  ;;  %v533_v21 = vld [vmem:[%s2487_s22 + $0x148] sm:$0xff] }
  0xac   : > { %v528_v23 = vld [vmem:[%s2487_s22 + $0x120] sm:$0xff]  ;;  %967 = vmatpush.msra.mxu3 %v728_v22  ;;  %v601_v22 = vld [vmem:[%s2487_s22 + $0x368] sm:$0xff] }
  0xad   : > { %v592_v24 = vld [vmem:[%s2487_s22 + $0x320] sm:$0xff]  ;;  %909 = vmatpush.msra.mxu0 %v528_v23  ;;  %v490_v23 = vld [vmem:[%s3138_s0] sm:$0xff] }
  0xae   : > { %v656_v25 = vld [vmem:[%s2487_s22 + $0x520] sm:$0xff]  ;;  %929 = vmatpush.msra.mxu1 %v592_v24  ;;  %888 = vst [vmem:[#allocation1] ss:$4 sm:$0xff] %v490_v23  ;;  %v665_v23 = vld [vmem:[%s2487_s22 + $0x568] sm:$0xff] }
  0xaf   : > { %v724_v26 = vld [vmem:[%s2487_s22 + $0x740] sm:$0xff]  ;;  %949 = vmatpush.msra.mxu2 %v656_v25 }
  0xb0   : > { %v524_v27 = vld [vmem:[%s2487_s22 + $0x100] sm:$0xff]  ;;  %968 = vmatpush.msra.mxu3 %v724_v26  ;;  %v529_v26 = vld [vmem:[%s2487_s22 + $0x128] sm:$0xff] }
  0xb1   : > { %v588_v28 = vld [vmem:[%s2487_s22 + $0x300] sm:$0xff]  ;;  %910 = vmatpush.msra.mxu0 %v524_v27  ;;  %v597_v27 = vld [vmem:[%s2487_s22 + $0x348] sm:$0xff] }
  0xb2   : > { %v652_v29 = vld [vmem:[%s2487_s22 + $0x500] sm:$0xff]  ;;  %930 = vmatpush.msra.mxu1 %v588_v28 }
  0xb3   : > { %v720_v30 = vld [vmem:[%s2487_s22 + $0x720] sm:$0xff]  ;;  %950 = vmatpush.msra.mxu2 %v652_v29 }
  0xb4   : > { %v520_v31 = vld [vmem:[%s2487_s22 + $0xe0] sm:$0xff]  ;;  %969 = vmatpush.msra.mxu3 %v720_v30  ;;  %v525_v30 = vld [vmem:[%s2487_s22 + $0x108] sm:$0xff] }
  0xb5   : > { %v584_v32 = vld [vmem:[%s2487_s22 + $0x2e0] sm:$0xff]  ;;  %911 = vmatpush.msra.mxu0 %v520_v31  ;;  %v593_v31 = vld [vmem:[%s2487_s22 + $0x328] sm:$0xff] }
  0xb6   : > { %v648_v33 = vld [vmem:[%s2487_s22 + $0x4e0] sm:$0xff]  ;;  %931 = vmatpush.msra.mxu1 %v584_v32 }
  0xb7   : > { %v716_v34 = vld [vmem:[%s2487_s22 + $0x700] sm:$0xff]  ;;  %951 = vmatpush.msra.mxu2 %v648_v33 }
  0xb8   : > { %v516_v35 = vld [vmem:[%s2487_s22 + $0xc0] sm:$0xff]  ;;  %970 = vmatpush.msra.mxu3 %v716_v34  ;;  %v521_v34 = vld [vmem:[%s2487_s22 + $0xe8] sm:$0xff] }
  0xb9   : > { %v580_v36 = vld [vmem:[%s2487_s22 + $0x2c0] sm:$0xff]  ;;  %912 = vmatpush.msra.mxu0 %v516_v35  ;;  %v589_v35 = vld [vmem:[%s2487_s22 + $0x308] sm:$0xff] }
  0xba   : > { %v644_v37 = vld [vmem:[%s2487_s22 + $0x4c0] sm:$0xff]  ;;  %932 = vmatpush.msra.mxu1 %v580_v36 }
  0xbb   : > { %v712_v38 = vld [vmem:[%s2487_s22 + $0x6e0] sm:$0xff]  ;;  %952 = vmatpush.msra.mxu2 %v644_v37 }
  0xbc   : > { %v512_v39 = vld [vmem:[%s2487_s22 + $0xa0] sm:$0xff]  ;;  %971 = vmatpush.msra.mxu3 %v712_v38 }
  0xbd   : > { %v576_v40 = vld [vmem:[%s2487_s22 + $0x2a0] sm:$0xff]  ;;  %913 = vmatpush.msra.mxu0 %v512_v39  ;;  %v517_v39 = vld [vmem:[%s2487_s22 + $0xc8] sm:$0xff] }
  0xbe   : > { %v640_v41 = vld [vmem:[%s2487_s22 + $0x4a0] sm:$0xff]  ;;  %933 = vmatpush.msra.mxu1 %v576_v40  ;;  %v585_v40 = vld [vmem:[%s2487_s22 + $0x2e8] sm:$0xff] }
  0xbf   : > { %v708_v42 = vld [vmem:[%s2487_s22 + $0x6c0] sm:$0xff]  ;;  %953 = vmatpush.msra.mxu2 %v640_v41 }
  0xc0   : > { %v508_v43 = vld [vmem:[%s2487_s22 + $0x80] sm:$0xff]  ;;  %972 = vmatpush.msra.mxu3 %v708_v42 }
  0xc1   : > { %v572_v44 = vld [vmem:[%s2487_s22 + $0x280] sm:$0xff]  ;;  %914 = vmatpush.msra.mxu0 %v508_v43  ;;  %v513_v43 = vld [vmem:[%s2487_s22 + $0xa8] sm:$0xff] }
  0xc2   : > { %v636_v45 = vld [vmem:[%s2487_s22 + $0x480] sm:$0xff]  ;;  %934 = vmatpush.msra.mxu1 %v572_v44  ;;  %v581_v44 = vld [vmem:[%s2487_s22 + $0x2c8] sm:$0xff] }
  0xc3   : > { %v704_v46 = vld [vmem:[%s2487_s22 + $0x6a0] sm:$0xff]  ;;  %954 = vmatpush.msra.mxu2 %v636_v45 }
  0xc4   : > { %v504_v47 = vld [vmem:[%s2487_s22 + $0x60] sm:$0xff]  ;;  %973 = vmatpush.msra.mxu3 %v704_v46 }
  0xc5   : > { %v568_v48 = vld [vmem:[%s2487_s22 + $0x260] sm:$0xff]  ;;  %915 = vmatpush.msra.mxu0 %v504_v47  ;;  %v509_v47 = vld [vmem:[%s2487_s22 + $0x88] sm:$0xff] }
  0xc6   : > { %v632_v49 = vld [vmem:[%s2487_s22 + $0x460] sm:$0xff]  ;;  %935 = vmatpush.msra.mxu1 %v568_v48  ;;  %v577_v48 = vld [vmem:[%s2487_s22 + $0x2a8] sm:$0xff] }
  0xc7   : > { %v700_v50 = vld [vmem:[%s2487_s22 + $0x680] sm:$0xff]  ;;  %955 = vmatpush.msra.mxu2 %v632_v49 }
  0xc8   : > { %v500_v51 = vld [vmem:[%s2487_s22 + $0x40] sm:$0xff]  ;;  %974 = vmatpush.msra.mxu3 %v700_v50 }
  0xc9   : > { %v564_v52 = vld [vmem:[%s2487_s22 + $0x240] sm:$0xff]  ;;  %916 = vmatpush.msra.mxu0 %v500_v51  ;;  %v505_v51 = vld [vmem:[%s2487_s22 + $0x68] sm:$0xff] }
  0xca   : > { %v628_v53 = vld [vmem:[%s2487_s22 + $0x440] sm:$0xff]  ;;  %936 = vmatpush.msra.mxu1 %v564_v52  ;;  %v573_v52 = vld [vmem:[%s2487_s22 + $0x288] sm:$0xff] }
  0xcb   : > { %v696_v54 = vld [vmem:[%s2487_s22 + $0x660] sm:$0xff]  ;;  %956 = vmatpush.msra.mxu2 %v628_v53 }
  0xcc   : > { %v496_v55 = vld [vmem:[%s2487_s22 + $0x20] sm:$0xff]  ;;  %975 = vmatpush.msra.mxu3 %v696_v54 }
  0xcd   : > { %v560_v56 = vld [vmem:[%s2487_s22 + $0x220] sm:$0xff]  ;;  %917 = vmatpush.msra.mxu0 %v496_v55  ;;  %v501_v55 = vld [vmem:[%s2487_s22 + $0x48] sm:$0xff] }
  0xce   : > { %v624_v57 = vld [vmem:[%s2487_s22 + $0x420] sm:$0xff]  ;;  %937 = vmatpush.msra.mxu1 %v560_v56  ;;  %v569_v56 = vld [vmem:[%s2487_s22 + $0x268] sm:$0xff] }
  0xcf   : > { %v692_v58 = vld [vmem:[%s2487_s22 + $0x640] sm:$0xff]  ;;  %957 = vmatpush.msra.mxu2 %v624_v57 }
  0xd0   : > { %v492_v59 = vld [vmem:[%s2487_s22] sm:$0xff]  ;;  %976 = vmatpush.msra.mxu3 %v692_v58 }
  0xd1   : > { %v556_v60 = vld [vmem:[%s2487_s22 + $0x200] sm:$0xff]  ;;  %918 = vmatpush.msra.mxu0 %v492_v59  ;;  %v497_v59 = vld [vmem:[%s2487_s22 + $0x28] sm:$0xff] }
  0xd2   : > { %v620_v61 = vld [vmem:[%s2487_s22 + $0x400] sm:$0xff]  ;;  %938 = vmatpush.msra.mxu1 %v556_v60  ;;  %v565_v60 = vld [vmem:[%s2487_s22 + $0x248] sm:$0xff] }
  0xd3   : > { %v688_v62 = vld [vmem:[%s2487_s22 + $0x620] sm:$0xff]  ;;  %958 = vmatpush.msra.mxu2 %v620_v61  ;;  %v2649_v61 = vld.sshfl [vmem:[#allocation1 + $0x10] sm:$0xff pattern:$0x73625140] }
  0xd4   : > { %v808_v63 = vld [vmem:[%s2487_s22 + $0x9e0] sm:$0xff]  ;;  %977 = vmatpush.msra.mxu3 %v688_v62  ;;  %959 = vmatmul.f32.vlgmr.msra.gmra.mxu2 %v2649_v61 }
  0xd5   : > { %v872_v0 = vld [vmem:[%s2487_s22 + $0xbe0] sm:$0xff]  ;;  %983 = vmatpush.msrb.mxu0 %v808_v63  ;;  %1023 = vmatpush.msrb.mxu2 %v553_v1  ;;  %v561_v1 = vld [vmem:[%s2487_s22 + $0x228] sm:$0xff] }
  0xd6   : > { %v684_v2 = vld [vmem:[%s2487_s22 + $0x600] sm:$0xff]  ;;  %1003 = vmatpush.msrb.mxu1 %v872_v0  ;;  %v493_v0 = vld [vmem:[%s2487_s22 + $0x8] sm:$0xff] }
  0xd7   : > { %v804_v3 = vld [vmem:[%s2487_s22 + $0x9c0] sm:$0xff]  ;;  %978 = vmatpush.msra.mxu3 %v684_v2  ;;  %1024 = vmatpush.msrb.mxu2 %v549_v5  ;;  %v2655_v2 = vld.sshfl [vmem:[#allocation1] sm:$0xff pattern:$0x73625140]  ;;  %v681_v5 = vld [vmem:[%s2487_s22 + $0x5e8] sm:$0xff] }
  0xd8   : > { %v868_v4 = vld [vmem:[%s2487_s22 + $0xbc0] sm:$0xff]  ;;  %984 = vmatpush.msrb.mxu0 %v804_v3 }
  0xd9   : > { %v800_v7 = vld [vmem:[%s2487_s22 + $0x9a0] sm:$0xff]  ;;  %1004 = vmatpush.msrb.mxu1 %v868_v4  ;;  %1043 = vmatpush.msrb.mxu3 %v617_v6  ;;  %v2660_v4 = vld.sshfl [vmem:[#allocation1 + $0x18] sm:$0xff pattern:$0x73625140]  ;;  %v745_v6 = vld [vmem:[%s2487_s22 + $0x7e8] sm:$0xff] }
  0xda   : > { %v864_v8 = vld [vmem:[%s2487_s22 + $0xba0] sm:$0xff]  ;;  %985 = vmatpush.msrb.mxu0 %v800_v7  ;;  %1025 = vmatpush.msrb.mxu2 %v545_v9  ;;  %v809_v7 = vld [vmem:[%s2487_s22 + $0x9e8] sm:$0xff] }
  0xdb   : > { %v796_v11 = vld [vmem:[%s2487_s22 + $0x980] sm:$0xff]  ;;  %1005 = vmatpush.msrb.mxu1 %v864_v8  ;;  %1044 = vmatpush.msrb.mxu3 %v613_v10  ;;  %v557_v8 = vld [vmem:[%s2487_s22 + $0x208] sm:$0xff] }
  0xdc   : > { %v860_v12 = vld [vmem:[%s2487_s22 + $0xb80] sm:$0xff]  ;;  %986 = vmatpush.msrb.mxu0 %v796_v11  ;;  %1026 = vmatpush.msrb.mxu2 %v541_v13  ;;  %v677_v9 = vld [vmem:[%s2487_s22 + $0x5c8] sm:$0xff] }
  0xdd   : > { %v792_v15 = vld [vmem:[%s2487_s22 + $0x960] sm:$0xff]  ;;  %1006 = vmatpush.msrb.mxu1 %v860_v12  ;;  %1045 = vmatpush.msrb.mxu3 %v609_v14  ;;  %v741_v10 = vld [vmem:[%s2487_s22 + $0x7c8] sm:$0xff] }
  0xde   : > { %v856_v16 = vld [vmem:[%s2487_s22 + $0xb60] sm:$0xff]  ;;  %987 = vmatpush.msrb.mxu0 %v792_v15  ;;  %1027 = vmatpush.msrb.mxu2 %v537_v17  ;;  %v805_v11 = vld [vmem:[%s2487_s22 + $0x9c8] sm:$0xff] }
  0xdf   : > { %v788_v19 = vld [vmem:[%s2487_s22 + $0x940] sm:$0xff]  ;;  %1007 = vmatpush.msrb.mxu1 %v856_v16  ;;  %1046 = vmatpush.msrb.mxu3 %v605_v18  ;;  %v873_v12 = vld [vmem:[%s2487_s22 + $0xbe8] sm:$0xff] }
  0xe0   : > { %v852_v20 = vld [vmem:[%s2487_s22 + $0xb40] sm:$0xff]  ;;  %988 = vmatpush.msrb.mxu0 %v788_v19  ;;  %1028 = vmatpush.msrb.mxu2 %v533_v21  ;;  %v673_v13 = vld [vmem:[%s2487_s22 + $0x5a8] sm:$0xff] }
  0xe1   : > { %v784_v24 = vld [vmem:[%s2487_s22 + $0x920] sm:$0xff]  ;;  %1008 = vmatpush.msrb.mxu1 %v852_v20  ;;  %1047 = vmatpush.msrb.mxu3 %v601_v22  ;;  %v737_v14 = vld [vmem:[%s2487_s22 + $0x7a8] sm:$0xff] }
  0xe2   : > { %v848_v25 = vld [vmem:[%s2487_s22 + $0xb20] sm:$0xff]  ;;  %989 = vmatpush.msrb.mxu0 %v784_v24  ;;  %1029 = vmatpush.msrb.mxu2 %v529_v26  ;;  %v801_v15 = vld [vmem:[%s2487_s22 + $0x9a8] sm:$0xff] }
  0xe3   : > { %v780_v28 = vld [vmem:[%s2487_s22 + $0x900] sm:$0xff]  ;;  %1009 = vmatpush.msrb.mxu1 %v848_v25  ;;  %1048 = vmatpush.msrb.mxu3 %v597_v27  ;;  %v869_v16 = vld [vmem:[%s2487_s22 + $0xbc8] sm:$0xff] }
  0xe4   : > { %v844_v29 = vld [vmem:[%s2487_s22 + $0xb00] sm:$0xff]  ;;  %990 = vmatpush.msrb.mxu0 %v780_v28  ;;  %1030 = vmatpush.msrb.mxu2 %v525_v30  ;;  %v669_v17 = vld [vmem:[%s2487_s22 + $0x588] sm:$0xff] }
  0xe5   : > { %v776_v32 = vld [vmem:[%s2487_s22 + $0x8e0] sm:$0xff]  ;;  %1010 = vmatpush.msrb.mxu1 %v844_v29  ;;  %1049 = vmatpush.msrb.mxu3 %v593_v31  ;;  %v733_v18 = vld [vmem:[%s2487_s22 + $0x788] sm:$0xff] }
  0xe6   : > { %v840_v33 = vld [vmem:[%s2487_s22 + $0xae0] sm:$0xff]  ;;  %991 = vmatpush.msrb.mxu0 %v776_v32  ;;  %1031 = vmatpush.msrb.mxu2 %v521_v34  ;;  %v797_v19 = vld [vmem:[%s2487_s22 + $0x988] sm:$0xff] }
  0xe7   : > { %v772_v36 = vld [vmem:[%s2487_s22 + $0x8c0] sm:$0xff]  ;;  %1011 = vmatpush.msrb.mxu1 %v840_v33  ;;  %1050 = vmatpush.msrb.mxu3 %v589_v35  ;;  %v865_v20 = vld [vmem:[%s2487_s22 + $0xba8] sm:$0xff] }
  0xe8   : > { %v836_v37 = vld [vmem:[%s2487_s22 + $0xac0] sm:$0xff]  ;;  %992 = vmatpush.msrb.mxu0 %v772_v36  ;;  %1032 = vmatpush.msrb.mxu2 %v517_v39  ;;  %v729_v22 = vld [vmem:[%s2487_s22 + $0x768] sm:$0xff] }
  0xe9   : > { %v491_v38 = vld [vmem:[%s3138_s0 + $0x8] sm:$0xf]  ;;  %1012 = vmatpush.msrb.mxu1 %v836_v37  ;;  %1051 = vmatpush.msrb.mxu3 %v585_v40  ;;  %v793_v24 = vld [vmem:[%s2487_s22 + $0x968] sm:$0xff] }
  0xea   : > { %v768_v41 = vld [vmem:[%s2487_s22 + $0x8a0] sm:$0xff]  ;;  %890 = vst [vmem:[#allocation1 + $0x20] ss:$4 sm:$0xff] %v491_v38  ;;  %1033 = vmatpush.msrb.mxu2 %v513_v43  ;;  %919 = vmatmul.f32.vlgmr.msra.gmra.mxu0 %v2655_v2  ;;  %v861_v25 = vld [vmem:[%s2487_s22 + $0xb88] sm:$0xff] }
  0xeb   : > { %v832_v42 = vld [vmem:[%s2487_s22 + $0xaa0] sm:$0xff]  ;;  %993 = vmatpush.msrb.mxu0 %v768_v41  ;;  %1052 = vmatpush.msrb.mxu3 %v581_v44  ;;  %v661_v27 = vld [vmem:[%s2487_s22 + $0x548] sm:$0xff] }
  0xec   : > { %v764_v45 = vld [vmem:[%s2487_s22 + $0x880] sm:$0xff]  ;;  %1013 = vmatpush.msrb.mxu1 %v832_v42  ;;  %1034 = vmatpush.msrb.mxu2 %v509_v47  ;;  %v725_v28 = vld [vmem:[%s2487_s22 + $0x748] sm:$0xff] }
  0xed   : > { %v828_v46 = vld [vmem:[%s2487_s22 + $0xa80] sm:$0xff]  ;;  %994 = vmatpush.msrb.mxu0 %v764_v45  ;;  %1053 = vmatpush.msrb.mxu3 %v577_v48  ;;  %v789_v29 = vld [vmem:[%s2487_s22 + $0x948] sm:$0xff] }
  0xee   : > { %v760_v49 = vld [vmem:[%s2487_s22 + $0x860] sm:$0xff]  ;;  %1014 = vmatpush.msrb.mxu1 %v828_v46  ;;  %1035 = vmatpush.msrb.mxu2 %v505_v51  ;;  %v857_v30 = vld [vmem:[%s2487_s22 + $0xb68] sm:$0xff] }
  0xef   : > { %v824_v50 = vld [vmem:[%s2487_s22 + $0xa60] sm:$0xff]  ;;  %995 = vmatpush.msrb.mxu0 %v760_v49  ;;  %1054 = vmatpush.msrb.mxu3 %v573_v52  ;;  %v657_v31 = vld [vmem:[%s2487_s22 + $0x528] sm:$0xff] }
  0xf0   : > { %v756_v53 = vld [vmem:[%s2487_s22 + $0x840] sm:$0xff]  ;;  %1015 = vmatpush.msrb.mxu1 %v824_v50  ;;  %1036 = vmatpush.msrb.mxu2 %v501_v55  ;;  %v721_v32 = vld [vmem:[%s2487_s22 + $0x728] sm:$0xff] }
  0xf1   : > { %v820_v54 = vld [vmem:[%s2487_s22 + $0xa40] sm:$0xff]  ;;  %996 = vmatpush.msrb.mxu0 %v756_v53  ;;  %1055 = vmatpush.msrb.mxu3 %v569_v56  ;;  %v2681_v21 = vld.sshfl [vmem:[#allocation1 + $0x20] sm:$0xff pattern:$0x73625140]  ;;  %v785_v33 = vld [vmem:[%s2487_s22 + $0x928] sm:$0xff] }
  0xf2   : > { %v752_v57 = vld [vmem:[%s2487_s22 + $0x820] sm:$0xff]  ;;  %1016 = vmatpush.msrb.mxu1 %v820_v54  ;;  %1037 = vmatpush.msrb.mxu2 %v497_v59  ;;  %v853_v34 = vld [vmem:[%s2487_s22 + $0xb48] sm:$0xff] }
  0xf3   : > { %v816_v58 = vld [vmem:[%s2487_s22 + $0xa20] sm:$0xff]  ;;  %997 = vmatpush.msrb.mxu0 %v752_v57  ;;  %1056 = vmatpush.msrb.mxu3 %v565_v60  ;;  %v653_v35 = vld [vmem:[%s2487_s22 + $0x508] sm:$0xff] }
  0xf4   : > { %v748_v62 = vld [vmem:[%s2487_s22 + $0x800] sm:$0xff]  ;;  %1017 = vmatpush.msrb.mxu1 %v816_v58  ;;  %1038 = vmatpush.msrb.mxu2 %v493_v0  ;;  %v717_v36 = vld [vmem:[%s2487_s22 + $0x708] sm:$0xff] }
  0xf5   : > { %v812_v63 = vld [vmem:[%s2487_s22 + $0xa00] sm:$0xff]  ;;  %998 = vmatpush.msrb.mxu0 %v748_v62  ;;  %1057 = vmatpush.msrb.mxu3 %v561_v1  ;;  %v781_v37 = vld [vmem:[%s2487_s22 + $0x908] sm:$0xff] }
  0xf6   : > { %v2658_v3 = vld.sshfl [vmem:[#allocation1 + $0x8] sm:$0xff pattern:$0x73625140]  ;;  %1018 = vmatpush.msrb.mxu1 %v812_v63  ;;  %979 = vmatmul.f32.vlgmr.msra.gmra.mxu3 %v2660_v4  ;;  %v849_v38 = vld [vmem:[%s2487_s22 + $0xb28] sm:$0xff] }
  0xf7   : > { %939 = vmatmul.f32.vlgmr.msra.gmra.mxu1 %v2658_v3  ;;  %1063 = vmatpush.msra.mxu0 %v681_v5  ;;  %v2687_v26 = vld.sshfl [vmem:[#allocation1 + $0x28] sm:$0xff pattern:$0x73625140]  ;;  %v649_v39 = vld [vmem:[%s2487_s22 + $0x4e8] sm:$0xff] }
  0xf8   : > { %1083 = vmatpush.msra.mxu1 %v745_v6  ;;  %1103 = vmatpush.msra.mxu2 %v809_v7  ;;  %v713_v40 = vld [vmem:[%s2487_s22 + $0x6e8] sm:$0xff] }
  0xf9   : > { %1058 = vmatpush.msrb.mxu3 %v557_v8  ;;  %1064 = vmatpush.msra.mxu0 %v677_v9  ;;  %v777_v41 = vld [vmem:[%s2487_s22 + $0x8e8] sm:$0xff] }
  0xfa   : > { %1084 = vmatpush.msra.mxu1 %v741_v10  ;;  %1104 = vmatpush.msra.mxu2 %v805_v11  ;;  %v845_v42 = vld [vmem:[%s2487_s22 + $0xb08] sm:$0xff]  ;;  %v554_v11 = vld [vmem:[%s2487_s22 + $0x1f0] sm:$0xff] }
  0xfb   : > { %1123 = vmatpush.msra.mxu3 %v873_v12  ;;  %1065 = vmatpush.msra.mxu0 %v673_v13  ;;  %v645_v43 = vld [vmem:[%s2487_s22 + $0x4c8] sm:$0xff]  ;;  %v618_v12 = vld [vmem:[%s2487_s22 + $0x3f0] sm:$0xff] }
  0xfc   : > { %1085 = vmatpush.msra.mxu1 %v737_v14  ;;  %1105 = vmatpush.msra.mxu2 %v801_v15  ;;  %v709_v44 = vld [vmem:[%s2487_s22 + $0x6c8] sm:$0xff]  ;;  %v682_v13 = vld [vmem:[%s2487_s22 + $0x5f0] sm:$0xff] }
  0xfd   : > { %1124 = vmatpush.msra.mxu3 %v869_v16  ;;  %1066 = vmatpush.msra.mxu0 %v669_v17  ;;  %v773_v45 = vld [vmem:[%s2487_s22 + $0x8c8] sm:$0xff]  ;;  %v550_v15 = vld [vmem:[%s2487_s22 + $0x1d0] sm:$0xff] }
  0xfe   : > { %1086 = vmatpush.msra.mxu1 %v733_v18  ;;  %1106 = vmatpush.msra.mxu2 %v797_v19  ;;  %v841_v46 = vld [vmem:[%s2487_s22 + $0xae8] sm:$0xff]  ;;  %v614_v16 = vld [vmem:[%s2487_s22 + $0x3d0] sm:$0xff] }
  0xff   : > { %1125 = vmatpush.msra.mxu3 %v865_v20  ;;  %999 = vmatmul.f32.vlgmr.msrb.gmra.mxu0 %v2681_v21  ;;  %v641_v47 = vld [vmem:[%s2487_s22 + $0x4a8] sm:$0xff]  ;;  %v678_v17 = vld [vmem:[%s2487_s22 + $0x5d0] sm:$0xff] }
 0x100   : > { %1087 = vmatpush.msra.mxu1 %v729_v22  ;;  %1067 = vmatpush.msra.mxu0 %v665_v23  ;;  %v705_v48 = vld [vmem:[%s2487_s22 + $0x6a8] sm:$0xff]  ;;  %v746_v18 = vld [vmem:[%s2487_s22 + $0x7f0] sm:$0xff] }
 0x101   : > { %1107 = vmatpush.msra.mxu2 %v793_v24  ;;  %1126 = vmatpush.msra.mxu3 %v861_v25  ;;  %v769_v49 = vld [vmem:[%s2487_s22 + $0x8a8] sm:$0xff]  ;;  %v546_v19 = vld [vmem:[%s2487_s22 + $0x1b0] sm:$0xff] }
 0x102   : > { %1019 = vmatmul.f32.vlgmr.msrb.gmra.mxu1 %v2687_v26  ;;  %1068 = vmatpush.msra.mxu0 %v661_v27  ;;  %v837_v50 = vld [vmem:[%s2487_s22 + $0xac8] sm:$0xff]  ;;  %v610_v20 = vld [vmem:[%s2487_s22 + $0x3b0] sm:$0xff] }
 0x103   : > { %1088 = vmatpush.msra.mxu1 %v725_v28  ;;  %1108 = vmatpush.msra.mxu2 %v789_v29  ;;  %v637_v51 = vld [vmem:[%s2487_s22 + $0x488] sm:$0xff]  ;;  %v674_v22 = vld [vmem:[%s2487_s22 + $0x5b0] sm:$0xff] }
 0x104   : > { %1127 = vmatpush.msra.mxu3 %v857_v30  ;;  %1069 = vmatpush.msra.mxu0 %v657_v31  ;;  %v701_v52 = vld [vmem:[%s2487_s22 + $0x688] sm:$0xff]  ;;  %v742_v23 = vld [vmem:[%s2487_s22 + $0x7d0] sm:$0xff] }
 0x105   : > { %1089 = vmatpush.msra.mxu1 %v721_v32  ;;  %1109 = vmatpush.msra.mxu2 %v785_v33  ;;  %v765_v53 = vld [vmem:[%s2487_s22 + $0x888] sm:$0xff]  ;;  %v542_v24 = vld [vmem:[%s2487_s22 + $0x190] sm:$0xff] }
 0x106   : > { %1128 = vmatpush.msra.mxu3 %v853_v34  ;;  %1070 = vmatpush.msra.mxu0 %v653_v35  ;;  %v833_v54 = vld [vmem:[%s2487_s22 + $0xaa8] sm:$0xff]  ;;  %v606_v25 = vld [vmem:[%s2487_s22 + $0x390] sm:$0xff] }
 0x107   : > { %1090 = vmatpush.msra.mxu1 %v717_v36  ;;  %1110 = vmatpush.msra.mxu2 %v781_v37  ;;  %v633_v55 = vld [vmem:[%s2487_s22 + $0x468] sm:$0xff]  ;;  %v670_v27 = vld [vmem:[%s2487_s22 + $0x590] sm:$0xff] }
 0x108   : > { %1129 = vmatpush.msra.mxu3 %v849_v38  ;;  %1071 = vmatpush.msra.mxu0 %v649_v39  ;;  %v697_v56 = vld [vmem:[%s2487_s22 + $0x668] sm:$0xff]  ;;  %v738_v28 = vld [vmem:[%s2487_s22 + $0x7b0] sm:$0xff] }
 0x109   : > { %1091 = vmatpush.msra.mxu1 %v713_v40  ;;  %1111 = vmatpush.msra.mxu2 %v777_v41  ;;  %v761_v57 = vld [vmem:[%s2487_s22 + $0x868] sm:$0xff]  ;;  %v538_v29 = vld [vmem:[%s2487_s22 + $0x170] sm:$0xff] }
 0x10a   : > { %1130 = vmatpush.msra.mxu3 %v845_v42  ;;  %1072 = vmatpush.msra.mxu0 %v645_v43  ;;  %v829_v58 = vld [vmem:[%s2487_s22 + $0xa88] sm:$0xff]  ;;  %v602_v30 = vld [vmem:[%s2487_s22 + $0x370] sm:$0xff] }
 0x10b   : > { %1092 = vmatpush.msra.mxu1 %v709_v44  ;;  %1112 = vmatpush.msra.mxu2 %v773_v45  ;;  %v629_v59 = vld [vmem:[%s2487_s22 + $0x448] sm:$0xff]  ;;  %v666_v31 = vld [vmem:[%s2487_s22 + $0x570] sm:$0xff] }
 0x10c   : > { %1131 = vmatpush.msra.mxu3 %v841_v46  ;;  %1073 = vmatpush.msra.mxu0 %v641_v47  ;;  %v693_v60 = vld [vmem:[%s2487_s22 + $0x648] sm:$0xff]  ;;  %v734_v32 = vld [vmem:[%s2487_s22 + $0x790] sm:$0xff] }
 0x10d   : > { %1093 = vmatpush.msra.mxu1 %v705_v48  ;;  %1113 = vmatpush.msra.mxu2 %v769_v49  ;;  %v757_v62 = vld [vmem:[%s2487_s22 + $0x848] sm:$0xff]  ;;  %v534_v33 = vld [vmem:[%s2487_s22 + $0x150] sm:$0xff] }
 0x10e   : > { %1132 = vmatpush.msra.mxu3 %v837_v50  ;;  %1074 = vmatpush.msra.mxu0 %v637_v51  ;;  %v825_v63 = vld [vmem:[%s2487_s22 + $0xa68] sm:$0xff]  ;;  %v598_v34 = vld [vmem:[%s2487_s22 + $0x350] sm:$0xff] }
 0x10f   : > { %1094 = vmatpush.msra.mxu1 %v701_v52  ;;  %1114 = vmatpush.msra.mxu2 %v765_v53  ;;  %v625_v0 = vld [vmem:[%s2487_s22 + $0x428] sm:$0xff]  ;;  %v662_v35 = vld [vmem:[%s2487_s22 + $0x550] sm:$0xff] }
 0x110   : > { %1133 = vmatpush.msra.mxu3 %v833_v54  ;;  %1039 = vmatmul.f32.vlgmr.msrb.gmra.mxu2 %v2655_v2  ;;  %v689_v1 = vld [vmem:[%s2487_s22 + $0x628] sm:$0xff]  ;;  %v730_v36 = vld [vmem:[%s2487_s22 + $0x770] sm:$0xff] }
 0x111   : > { %1075 = vmatpush.msra.mxu0 %v633_v55  ;;  %1095 = vmatpush.msra.mxu1 %v697_v56  ;;  %v753_v5 = vld [vmem:[%s2487_s22 + $0x828] sm:$0xff]  ;;  %v530_v37 = vld [vmem:[%s2487_s22 + $0x130] sm:$0xff] }
 0x112   : > { %1115 = vmatpush.msra.mxu2 %v761_v57  ;;  %1134 = vmatpush.msra.mxu3 %v829_v58  ;;  %v821_v6 = vld [vmem:[%s2487_s22 + $0xa48] sm:$0xff]  ;;  %v594_v38 = vld [vmem:[%s2487_s22 + $0x330] sm:$0xff] }
 0x113   : > { %1076 = vmatpush.msra.mxu0 %v629_v59  ;;  %1059 = vmatmul.f32.vlgmr.msrb.gmra.mxu3 %v2658_v3  ;;  %v621_v7 = vld [vmem:[%s2487_s22 + $0x408] sm:$0xff]  ;;  %v658_v39 = vld [vmem:[%s2487_s22 + $0x530] sm:$0xff] }
 0x114   : > { %1096 = vmatpush.msra.mxu1 %v693_v60  ;;  %1116 = vmatpush.msra.mxu2 %v757_v62  ;;  %v685_v8 = vld [vmem:[%s2487_s22 + $0x608] sm:$0xff]  ;;  %v726_v40 = vld [vmem:[%s2487_s22 + $0x750] sm:$0xff] }
 0x115   : > { %1135 = vmatpush.msra.mxu3 %v825_v63  ;;  %1077 = vmatpush.msra.mxu0 %v625_v0  ;;  %v749_v9 = vld [vmem:[%s2487_s22 + $0x808] sm:$0xff]  ;;  %v526_v41 = vld [vmem:[%s2487_s22 + $0x110] sm:$0xff] }
 0x116   : > { %1097 = vmatpush.msra.mxu1 %v689_v1  ;;  %v817_v10 = vld [vmem:[%s2487_s22 + $0xa28] sm:$0xff]  ;;  %1117 = vmatpush.msra.mxu2 %v753_v5  ;;  %v590_v42 = vld [vmem:[%s2487_s22 + $0x310] sm:$0xff] }
 0x117   : > { %1136 = vmatpush.msra.mxu3 %v821_v6  ;;  %1078 = vmatpush.msra.mxu0 %v621_v7  ;;  %v813_v14 = vld [vmem:[%s2487_s22 + $0xa08] sm:$0xff]  ;;  %v654_v43 = vld [vmem:[%s2487_s22 + $0x510] sm:$0xff] }
 0x118   : > { %1098 = vmatpush.msra.mxu1 %v685_v8  ;;  %1118 = vmatpush.msra.mxu2 %v749_v9  ;;  %v722_v44 = vld [vmem:[%s2487_s22 + $0x730] sm:$0xff] }
 0x119   : > { %1137 = vmatpush.msra.mxu3 %v817_v10  ;;  %1119 = vmatmul.f32.vlgmr.msra.gmra.mxu2 %v2681_v21  ;;  %v522_v45 = vld [vmem:[%s2487_s22 + $0xf0] sm:$0xff] }
 0x11a   : > { %1143 = vmatpush.msrb.mxu0 %v554_v11  ;;  %1163 = vmatpush.msrb.mxu1 %v618_v12  ;;  %v586_v46 = vld [vmem:[%s2487_s22 + $0x2f0] sm:$0xff] }
 0x11b   : > { %1183 = vmatpush.msrb.mxu2 %v682_v13  ;;  %1138 = vmatpush.msra.mxu3 %v813_v14  ;;  %v650_v47 = vld [vmem:[%s2487_s22 + $0x4f0] sm:$0xff] }
 0x11c   : > { %1079 = vmatmul.f32.vlgmr.msra.gmra.mxu0 %v2649_v61  ;;  %1139 = vmatmul.f32.vlgmr.msra.gmra.mxu3 %v2687_v26  ;;  %v718_v48 = vld [vmem:[%s2487_s22 + $0x710] sm:$0xff] }
 0x11d   : > { %1144 = vmatpush.msrb.mxu0 %v550_v15  ;;  %1164 = vmatpush.msrb.mxu1 %v614_v16  ;;  %v518_v49 = vld [vmem:[%s2487_s22 + $0xd0] sm:$0xff] }
 0x11e   : > { %1184 = vmatpush.msrb.mxu2 %v678_v17  ;;  %1203 = vmatpush.msrb.mxu3 %v746_v18  ;;  %v582_v50 = vld [vmem:[%s2487_s22 + $0x2d0] sm:$0xff] }
 0x11f   : > { %1099 = vmatmul.f32.vlgmr.msra.gmra.mxu1 %v2660_v4  ;;  %1145 = vmatpush.msrb.mxu0 %v546_v19  ;;  %v646_v51 = vld [vmem:[%s2487_s22 + $0x4d0] sm:$0xff]  ;;  %v555_v19 = vld [vmem:[%s2487_s22 + $0x1f8] sm:$0xff] }
 0x120   : > { %1165 = vmatpush.msrb.mxu1 %v610_v20  ;;  %1185 = vmatpush.msrb.mxu2 %v674_v22  ;;  %v714_v52 = vld [vmem:[%s2487_s22 + $0x6f0] sm:$0xff] }
 0x121   : > { %1204 = vmatpush.msrb.mxu3 %v742_v23  ;;  %1146 = vmatpush.msrb.mxu0 %v542_v24  ;;  %v514_v53 = vld [vmem:[%s2487_s22 + $0xb0] sm:$0xff]  ;;  %v551_v24 = vld [vmem:[%s2487_s22 + $0x1d8] sm:$0xff] }
 0x122   : > { %1166 = vmatpush.msrb.mxu1 %v606_v25  ;;  %1186 = vmatpush.msrb.mxu2 %v670_v27  ;;  %v578_v54 = vld [vmem:[%s2487_s22 + $0x2b0] sm:$0xff]  ;;  %v619_v25 = vld [vmem:[%s2487_s22 + $0x3f8] sm:$0xff] }
 0x123   : > { %1205 = vmatpush.msrb.mxu3 %v738_v28  ;;  %1147 = vmatpush.msrb.mxu0 %v538_v29  ;;  %v642_v55 = vld [vmem:[%s2487_s22 + $0x4b0] sm:$0xff]  ;;  %v547_v29 = vld [vmem:[%s2487_s22 + $0x1b8] sm:$0xff] }
 0x124   : > { %1167 = vmatpush.msrb.mxu1 %v602_v30  ;;  %1187 = vmatpush.msrb.mxu2 %v666_v31  ;;  %v710_v56 = vld [vmem:[%s2487_s22 + $0x6d0] sm:$0xff]  ;;  %v615_v30 = vld [vmem:[%s2487_s22 + $0x3d8] sm:$0xff] }
 0x125   : > { %1206 = vmatpush.msrb.mxu3 %v734_v32  ;;  %1148 = vmatpush.msrb.mxu0 %v534_v33  ;;  %v510_v57 = vld [vmem:[%s2487_s22 + $0x90] sm:$0xff]  ;;  %v543_v33 = vld [vmem:[%s2487_s22 + $0x198] sm:$0xff] }
 0x126   : > { %1168 = vmatpush.msrb.mxu1 %v598_v34  ;;  %1188 = vmatpush.msrb.mxu2 %v662_v35  ;;  %v574_v58 = vld [vmem:[%s2487_s22 + $0x290] sm:$0xff]  ;;  %v611_v34 = vld [vmem:[%s2487_s22 + $0x3b8] sm:$0xff] }
 0x127   : > { %1207 = vmatpush.msrb.mxu3 %v730_v36  ;;  %1149 = vmatpush.msrb.mxu0 %v530_v37  ;;  %v638_v59 = vld [vmem:[%s2487_s22 + $0x490] sm:$0xff]  ;;  %v539_v37 = vld [vmem:[%s2487_s22 + $0x178] sm:$0xff] }
 0x128   : > { %1169 = vmatpush.msrb.mxu1 %v594_v38  ;;  %1189 = vmatpush.msrb.mxu2 %v658_v39  ;;  %v706_v60 = vld [vmem:[%s2487_s22 + $0x6b0] sm:$0xff]  ;;  %v607_v38 = vld [vmem:[%s2487_s22 + $0x398] sm:$0xff] }
 0x129   : > { %1208 = vmatpush.msrb.mxu3 %v726_v40  ;;  %1150 = vmatpush.msrb.mxu0 %v526_v41  ;;  %v506_v62 = vld [vmem:[%s2487_s22 + $0x70] sm:$0xff]  ;;  %v535_v41 = vld [vmem:[%s2487_s22 + $0x158] sm:$0xff] }
 0x12a   : > { %1170 = vmatpush.msrb.mxu1 %v590_v42  ;;  %1190 = vmatpush.msrb.mxu2 %v654_v43  ;;  %v570_v63 = vld [vmem:[%s2487_s22 + $0x270] sm:$0xff]  ;;  %v603_v42 = vld [vmem:[%s2487_s22 + $0x378] sm:$0xff] }
 0x12b   : > { %1209 = vmatpush.msrb.mxu3 %v722_v44  ;;  %1151 = vmatpush.msrb.mxu0 %v522_v45  ;;  %v634_v0 = vld [vmem:[%s2487_s22 + $0x470] sm:$0xff]  ;;  %v531_v45 = vld [vmem:[%s2487_s22 + $0x138] sm:$0xff] }
 0x12c   : > { %1171 = vmatpush.msrb.mxu1 %v586_v46  ;;  %1191 = vmatpush.msrb.mxu2 %v650_v47  ;;  %v702_v1 = vld [vmem:[%s2487_s22 + $0x690] sm:$0xff]  ;;  %v599_v46 = vld [vmem:[%s2487_s22 + $0x358] sm:$0xff] }
 0x12d   : > { %1210 = vmatpush.msrb.mxu3 %v718_v48  ;;  %1152 = vmatpush.msrb.mxu0 %v518_v49  ;;  %v502_v5 = vld [vmem:[%s2487_s22 + $0x50] sm:$0xff]  ;;  %v527_v49 = vld [vmem:[%s2487_s22 + $0x118] sm:$0xff] }
 0x12e   : > { %1172 = vmatpush.msrb.mxu1 %v582_v50  ;;  %1192 = vmatpush.msrb.mxu2 %v646_v51  ;;  %v566_v6 = vld [vmem:[%s2487_s22 + $0x250] sm:$0xff]  ;;  %v595_v50 = vld [vmem:[%s2487_s22 + $0x338] sm:$0xff] }
 0x12f   : > { %1211 = vmatpush.msrb.mxu3 %v714_v52  ;;  %1153 = vmatpush.msrb.mxu0 %v514_v53  ;;  %v630_v7 = vld [vmem:[%s2487_s22 + $0x450] sm:$0xff]  ;;  %v523_v53 = vld [vmem:[%s2487_s22 + $0xf8] sm:$0xff] }
 0x130   : > { %1173 = vmatpush.msrb.mxu1 %v578_v54  ;;  %1193 = vmatpush.msrb.mxu2 %v642_v55  ;;  %v698_v8 = vld [vmem:[%s2487_s22 + $0x670] sm:$0xff]  ;;  %v591_v54 = vld [vmem:[%s2487_s22 + $0x318] sm:$0xff] }
 0x131   : > { %1212 = vmatpush.msrb.mxu3 %v710_v56  ;;  %1154 = vmatpush.msrb.mxu0 %v510_v57  ;;  %v498_v9 = vld [vmem:[%s2487_s22 + $0x30] sm:$0xff]  ;;  %v519_v57 = vld [vmem:[%s2487_s22 + $0xd8] sm:$0xff] }
 0x132   : > { %1174 = vmatpush.msrb.mxu1 %v574_v58  ;;  %1194 = vmatpush.msrb.mxu2 %v638_v59  ;;  %v562_v10 = vld [vmem:[%s2487_s22 + $0x230] sm:$0xff]  ;;  %v587_v58 = vld [vmem:[%s2487_s22 + $0x2f8] sm:$0xff] }
 0x133   : > { %1213 = vmatpush.msrb.mxu3 %v706_v60  ;;  %1155 = vmatpush.msrb.mxu0 %v506_v62  ;;  %v626_v11 = vld [vmem:[%s2487_s22 + $0x430] sm:$0xff]  ;;  %v515_v62 = vld [vmem:[%s2487_s22 + $0xb8] sm:$0xff] }
 0x134   : > { %1175 = vmatpush.msrb.mxu1 %v570_v63  ;;  %1195 = vmatpush.msrb.mxu2 %v634_v0  ;;  %v694_v12 = vld [vmem:[%s2487_s22 + $0x650] sm:$0xff]  ;;  %v583_v63 = vld [vmem:[%s2487_s22 + $0x2d8] sm:$0xff] }
 0x135   : > { %1214 = vmatpush.msrb.mxu3 %v702_v1  ;;  %1156 = vmatpush.msrb.mxu0 %v502_v5  ;;  %v494_v13 = vld [vmem:[%s2487_s22 + $0x10] sm:$0xff]  ;;  %v511_v5 = vld [vmem:[%s2487_s22 + $0x98] sm:$0xff] }
 0x136   : > { %1176 = vmatpush.msrb.mxu1 %v566_v6  ;;  %1196 = vmatpush.msrb.mxu2 %v630_v7  ;;  %v558_v14 = vld [vmem:[%s2487_s22 + $0x210] sm:$0xff]  ;;  %v579_v6 = vld [vmem:[%s2487_s22 + $0x2b8] sm:$0xff] }
 0x137   : > { %1215 = vmatpush.msrb.mxu3 %v698_v8  ;;  %1157 = vmatpush.msrb.mxu0 %v498_v9  ;;  %v622_v15 = vld [vmem:[%s2487_s22 + $0x410] sm:$0xff]  ;;  %v507_v9 = vld [vmem:[%s2487_s22 + $0x78] sm:$0xff] }
 0x138   : > { %1177 = vmatpush.msrb.mxu1 %v562_v10  ;;  %v690_v16 = vld [vmem:[%s2487_s22 + $0x630] sm:$0xff]  ;;  %1197 = vmatpush.msrb.mxu2 %v626_v11  ;;  %v575_v10 = vld [vmem:[%s2487_s22 + $0x298] sm:$0xff] }
 0x139   : > { %1216 = vmatpush.msrb.mxu3 %v694_v12  ;;  %v810_v17 = vld [vmem:[%s2487_s22 + $0x9f0] sm:$0xff]  ;;  %1158 = vmatpush.msrb.mxu0 %v494_v13  ;;  %v503_v12 = vld [vmem:[%s2487_s22 + $0x58] sm:$0xff] }
 0x13a   : > { %v874_v18 = vld [vmem:[%s2487_s22 + $0xbf0] sm:$0xff]  ;;  %1178 = vmatpush.msrb.mxu1 %v558_v14  ;;  %1198 = vmatpush.msrb.mxu2 %v622_v15  ;;  %v571_v13 = vld [vmem:[%s2487_s22 + $0x278] sm:$0xff] }
 0x13b   : > { %v686_v20 = vld [vmem:[%s2487_s22 + $0x610] sm:$0xff]  ;;  %1217 = vmatpush.msrb.mxu3 %v690_v16  ;;  %1223 = vmatpush.msra.mxu0 %v810_v17  ;;  %v567_v15 = vld [vmem:[%s2487_s22 + $0x258] sm:$0xff] }
 0x13c   : > { %v806_v22 = vld [vmem:[%s2487_s22 + $0x9d0] sm:$0xff]  ;;  %1243 = vmatpush.msra.mxu1 %v874_v18  ;;  %1263 = vmatpush.msra.mxu2 %v555_v19  ;;  %v495_v18 = vld [vmem:[%s2487_s22 + $0x18] sm:$0xff] }
 0x13d   : > { %v870_v23 = vld [vmem:[%s2487_s22 + $0xbd0] sm:$0xff]  ;;  %1218 = vmatpush.msrb.mxu3 %v686_v20  ;;  %1224 = vmatpush.msra.mxu0 %v806_v22  ;;  %v747_v19 = vld [vmem:[%s2487_s22 + $0x7f8] sm:$0xff] }
 0x13e   : > { %v802_v27 = vld [vmem:[%s2487_s22 + $0x9b0] sm:$0xff]  ;;  %1244 = vmatpush.msra.mxu1 %v870_v23  ;;  %1264 = vmatpush.msra.mxu2 %v551_v24  ;;  %v683_v20 = vld [vmem:[%s2487_s22 + $0x5f8] sm:$0xff] }
 0x13f   : > { %v866_v28 = vld [vmem:[%s2487_s22 + $0xbb0] sm:$0xff]  ;;  %1283 = vmatpush.msra.mxu3 %v619_v25  ;;  %1225 = vmatpush.msra.mxu0 %v802_v27  ;;  %v811_v22 = vld [vmem:[%s2487_s22 + $0x9f8] sm:$0xff] }
 0x140   : > { %v798_v31 = vld [vmem:[%s2487_s22 + $0x990] sm:$0xff]  ;;  %1245 = vmatpush.msra.mxu1 %v866_v28  ;;  %1265 = vmatpush.msra.mxu2 %v547_v29  ;;  %v559_v23 = vld [vmem:[%s2487_s22 + $0x218] sm:$0xff] }
 0x141   : > { %v862_v32 = vld [vmem:[%s2487_s22 + $0xb90] sm:$0xff]  ;;  %1284 = vmatpush.msra.mxu3 %v615_v30  ;;  %1226 = vmatpush.msra.mxu0 %v798_v31  ;;  %v679_v24 = vld [vmem:[%s2487_s22 + $0x5d8] sm:$0xff] }
 0x142   : > { %v794_v35 = vld [vmem:[%s2487_s22 + $0x970] sm:$0xff]  ;;  %1246 = vmatpush.msra.mxu1 %v862_v32  ;;  %1266 = vmatpush.msra.mxu2 %v543_v33  ;;  %v743_v25 = vld [vmem:[%s2487_s22 + $0x7d8] sm:$0xff] }
 0x143   : > { %v858_v36 = vld [vmem:[%s2487_s22 + $0xb70] sm:$0xff]  ;;  %1285 = vmatpush.msra.mxu3 %v611_v34  ;;  %1227 = vmatpush.msra.mxu0 %v794_v35  ;;  %v807_v27 = vld [vmem:[%s2487_s22 + $0x9d8] sm:$0xff] }
 0x144   : > { %v790_v39 = vld [vmem:[%s2487_s22 + $0x950] sm:$0xff]  ;;  %1247 = vmatpush.msra.mxu1 %v858_v36  ;;  %1267 = vmatpush.msra.mxu2 %v539_v37  ;;  %v875_v28 = vld [vmem:[%s2487_s22 + $0xbf8] sm:$0xff] }
 0x145   : > { %v854_v40 = vld [vmem:[%s2487_s22 + $0xb50] sm:$0xff]  ;;  %1286 = vmatpush.msra.mxu3 %v607_v38  ;;  %1228 = vmatpush.msra.mxu0 %v790_v39  ;;  %v675_v29 = vld [vmem:[%s2487_s22 + $0x5b8] sm:$0xff] }
 0x146   : > { %v786_v43 = vld [vmem:[%s2487_s22 + $0x930] sm:$0xff]  ;;  %1248 = vmatpush.msra.mxu1 %v854_v40  ;;  %1268 = vmatpush.msra.mxu2 %v535_v41  ;;  %v739_v30 = vld [vmem:[%s2487_s22 + $0x7b8] sm:$0xff] }
 0x147   : > { %v850_v44 = vld [vmem:[%s2487_s22 + $0xb30] sm:$0xff]  ;;  %1287 = vmatpush.msra.mxu3 %v603_v42  ;;  %1229 = vmatpush.msra.mxu0 %v786_v43  ;;  %v803_v31 = vld [vmem:[%s2487_s22 + $0x9b8] sm:$0xff] }
 0x148   : > { %v782_v47 = vld [vmem:[%s2487_s22 + $0x910] sm:$0xff]  ;;  %1249 = vmatpush.msra.mxu1 %v850_v44  ;;  %1269 = vmatpush.msra.mxu2 %v531_v45  ;;  %v871_v32 = vld [vmem:[%s2487_s22 + $0xbd8] sm:$0xff] }
 0x149   : > { %v846_v48 = vld [vmem:[%s2487_s22 + $0xb10] sm:$0xff]  ;;  %1288 = vmatpush.msra.mxu3 %v599_v46  ;;  %1230 = vmatpush.msra.mxu0 %v782_v47  ;;  %v671_v33 = vld [vmem:[%s2487_s22 + $0x598] sm:$0xff] }
 0x14a   : > { %v778_v51 = vld [vmem:[%s2487_s22 + $0x8f0] sm:$0xff]  ;;  %1250 = vmatpush.msra.mxu1 %v846_v48  ;;  %1270 = vmatpush.msra.mxu2 %v527_v49  ;;  %v735_v34 = vld [vmem:[%s2487_s22 + $0x798] sm:$0xff] }
 0x14b   : > { %v842_v52 = vld [vmem:[%s2487_s22 + $0xaf0] sm:$0xff]  ;;  %1289 = vmatpush.msra.mxu3 %v595_v50  ;;  %1231 = vmatpush.msra.mxu0 %v778_v51  ;;  %v799_v35 = vld [vmem:[%s2487_s22 + $0x998] sm:$0xff] }
 0x14c   : > { %v774_v55 = vld [vmem:[%s2487_s22 + $0x8d0] sm:$0xff]  ;;  %1251 = vmatpush.msra.mxu1 %v842_v52  ;;  %1271 = vmatpush.msra.mxu2 %v523_v53  ;;  %v867_v36 = vld [vmem:[%s2487_s22 + $0xbb8] sm:$0xff] }
 0x14d   : > { %v838_v56 = vld [vmem:[%s2487_s22 + $0xad0] sm:$0xff]  ;;  %1290 = vmatpush.msra.mxu3 %v591_v54  ;;  %1232 = vmatpush.msra.mxu0 %v774_v55  ;;  %v667_v37 = vld [vmem:[%s2487_s22 + $0x578] sm:$0xff] }
 0x14e   : > { %v770_v59 = vld [vmem:[%s2487_s22 + $0x8b0] sm:$0xff]  ;;  %1252 = vmatpush.msra.mxu1 %v838_v56  ;;  %1272 = vmatpush.msra.mxu2 %v519_v57  ;;  %v731_v38 = vld [vmem:[%s2487_s22 + $0x778] sm:$0xff] }
 0x14f   : > { %v834_v60 = vld [vmem:[%s2487_s22 + $0xab0] sm:$0xff]  ;;  %1291 = vmatpush.msra.mxu3 %v587_v58  ;;  %1233 = vmatpush.msra.mxu0 %v770_v59  ;;  %v795_v39 = vld [vmem:[%s2487_s22 + $0x978] sm:$0xff] }
 0x150   : > { %v766_v0 = vld [vmem:[%s2487_s22 + $0x890] sm:$0xff]  ;;  %1253 = vmatpush.msra.mxu1 %v834_v60  ;;  %1273 = vmatpush.msra.mxu2 %v515_v62  ;;  %v863_v40 = vld [vmem:[%s2487_s22 + $0xb98] sm:$0xff] }
 0x151   : > { %v830_v1 = vld [vmem:[%s2487_s22 + $0xa90] sm:$0xff]  ;;  %1292 = vmatpush.msra.mxu3 %v583_v63  ;;  %1199 = vmatmul.f32.vlgmr.msrb.gmra.mxu2 %v2649_v61  ;;  %v663_v41 = vld [vmem:[%s2487_s22 + $0x558] sm:$0xff] }
 0x152   : > { %1234 = vmatpush.msra.mxu0 %v766_v0  ;;  %v762_v7 = vld [vmem:[%s2487_s22 + $0x870] sm:$0xff]  ;;  %1254 = vmatpush.msra.mxu1 %v830_v1  ;;  %v727_v42 = vld [vmem:[%s2487_s22 + $0x758] sm:$0xff] }
 0x153   : > { %1274 = vmatpush.msra.mxu2 %v511_v5  ;;  %v826_v8 = vld [vmem:[%s2487_s22 + $0xa70] sm:$0xff]  ;;  %1293 = vmatpush.msra.mxu3 %v579_v6  ;;  %v791_v43 = vld [vmem:[%s2487_s22 + $0x958] sm:$0xff] }
 0x154   : > { %1159 = vmatmul.f32.vlgmr.msrb.gmra.mxu0 %v2655_v2  ;;  %1219 = vmatmul.f32.vlgmr.msrb.gmra.mxu3 %v2660_v4  ;;  %v758_v61 = vld [vmem:[%s2487_s22 + $0x850] sm:$0xff]  ;;  %v499_v4 = vld [vmem:[%s2487_s22 + $0x38] sm:$0xff] }
 0x155   : > { %1235 = vmatpush.msra.mxu0 %v762_v7  ;;  %v822_v11 = vld [vmem:[%s2487_s22 + $0xa50] sm:$0xff]  ;;  %1255 = vmatpush.msra.mxu1 %v826_v8  ;;  %v859_v44 = vld [vmem:[%s2487_s22 + $0xb78] sm:$0xff] }
 0x156   : > { %1275 = vmatpush.msra.mxu2 %v507_v9  ;;  %1294 = vmatpush.msra.mxu3 %v575_v10  ;;  %v754_v2 = vld [vmem:[%s2487_s22 + $0x830] sm:$0xff]  ;;  %v659_v45 = vld [vmem:[%s2487_s22 + $0x538] sm:$0xff] }
 0x157   : > { %1179 = vmatmul.f32.vlgmr.msrb.gmra.mxu1 %v2658_v3  ;;  %v818_v14 = vld [vmem:[%s2487_s22 + $0xa30] sm:$0xff]  ;;  %1236 = vmatpush.msra.mxu0 %v758_v61  ;;  %v563_v3 = vld [vmem:[%s2487_s22 + $0x238] sm:$0xff] }
 0x158   : > { %1256 = vmatpush.msra.mxu1 %v822_v11  ;;  %1276 = vmatpush.msra.mxu2 %v503_v12  ;;  %v750_v16 = vld [vmem:[%s2487_s22 + $0x810] sm:$0xff]  ;;  %v723_v46 = vld [vmem:[%s2487_s22 + $0x738] sm:$0xff] }
 0x159   : > { %1295 = vmatpush.msra.mxu3 %v571_v13  ;;  %v814_v17 = vld [vmem:[%s2487_s22 + $0xa10] sm:$0xff]  ;;  %1237 = vmatpush.msra.mxu0 %v754_v2  ;;  %v787_v47 = vld [vmem:[%s2487_s22 + $0x938] sm:$0xff] }
 0x15a   : > { %1257 = vmatpush.msra.mxu1 %v818_v14  ;;  %1277 = vmatpush.msra.mxu2 %v499_v4  ;;  %v855_v48 = vld [vmem:[%s2487_s22 + $0xb58] sm:$0xff] }
 0x15b   : > { %1296 = vmatpush.msra.mxu3 %v567_v15  ;;  %1238 = vmatpush.msra.mxu0 %v750_v16  ;;  %v655_v49 = vld [vmem:[%s2487_s22 + $0x518] sm:$0xff] }
 0x15c   : > { %1258 = vmatpush.msra.mxu1 %v814_v17  ;;  %1278 = vmatpush.msra.mxu2 %v495_v18  ;;  %v719_v50 = vld [vmem:[%s2487_s22 + $0x718] sm:$0xff]  ;;  %v2035_v17 = vld.sshfl [vmem:[#allocation1 + $0x8] sm:$0xff pattern:$0x73625140] }
 0x15d   : > { %1297 = vmatpush.msra.mxu3 %v563_v3  ;;  %1239 = vmatmul.f32.vlgmr.msra.gmra.mxu0 %v2681_v21  ;;  %v783_v51 = vld [vmem:[%s2487_s22 + $0x918] sm:$0xff] }
 0x15e   : > { %1323 = vmatpush.msrb.mxu1 %v747_v19  ;;  %1303 = vmatpush.msrb.mxu0 %v683_v20  ;;  %v851_v52 = vld [vmem:[%s2487_s22 + $0xb38] sm:$0xff] }
 0x15f   : > { %1343 = vmatpush.msrb.mxu2 %v811_v22  ;;  %1298 = vmatpush.msra.mxu3 %v559_v23  ;;  %v651_v53 = vld [vmem:[%s2487_s22 + $0x4f8] sm:$0xff]  ;;  %v2938_v22 = vld [vmem:[%s2495_s8] sm:$0xf] }
 0x160   : > { %1259 = vmatmul.f32.vlgmr.msra.gmra.mxu1 %v2687_v26  ;;  %1304 = vmatpush.msrb.mxu0 %v679_v24  ;;  %v715_v54 = vld [vmem:[%s2487_s22 + $0x6f8] sm:$0xff] }
 0x161   : > { %1324 = vmatpush.msrb.mxu1 %v743_v25  ;;  %1344 = vmatpush.msrb.mxu2 %v807_v27  ;;  %v779_v55 = vld [vmem:[%s2487_s22 + $0x8f8] sm:$0xff] }
 0x162   : > { %1363 = vmatpush.msrb.mxu3 %v875_v28  ;;  %1305 = vmatpush.msrb.mxu0 %v675_v29  ;;  %v847_v56 = vld [vmem:[%s2487_s22 + $0xb18] sm:$0xff]  ;;  %v878_v28 = vperm.slane %v2938_v22, 0 }
 0x163   : > { %1325 = vmatpush.msrb.mxu1 %v739_v30  ;;  %1345 = vmatpush.msrb.mxu2 %v803_v31  ;;  %v647_v57 = vld [vmem:[%s2487_s22 + $0x4d8] sm:$0xff]  ;;  %v1419_v31 = vld [vmem:[%s2503_s7 + $0xe0] sm:$0xff] }
 0x164   : > { %1364 = vmatpush.msrb.mxu3 %v871_v32  ;;  %1306 = vmatpush.msrb.mxu0 %v671_v33  ;;  %v711_v58 = vld [vmem:[%s2487_s22 + $0x6d8] sm:$0xff]  ;;  %v1451_v32 = vld [vmem:[%s2503_s7 + $0x1e0] sm:$0xff] }
 0x165   : > { %1326 = vmatpush.msrb.mxu1 %v735_v34  ;;  %1346 = vmatpush.msrb.mxu2 %v799_v35  ;;  %v775_v59 = vld [vmem:[%s2487_s22 + $0x8d8] sm:$0xff]  ;;  %v2036_v34 = vld.sshfl [vmem:[#allocation1 + $0x10] sm:$0xff pattern:$0x73625140] }
 0x166   : > { %1365 = vmatpush.msrb.mxu3 %v867_v36  ;;  %1307 = vmatpush.msrb.mxu0 %v667_v37  ;;  %v843_v60 = vld [vmem:[%s2487_s22 + $0xaf8] sm:$0xff]  ;;  %v2037_v37 = vld.sshfl [vmem:[#allocation1 + $0x18] sm:$0xff pattern:$0x73625140] }
 0x167   : > { %1327 = vmatpush.msrb.mxu1 %v731_v38  ;;  %1347 = vmatpush.msrb.mxu2 %v795_v39  ;;  %v643_v62 = vld [vmem:[%s2487_s22 + $0x4b8] sm:$0xff]  ;;  %v920_v30 = vpop.f32.mrf.mxu0  ;;  %v1415_v38 = vld [vmem:[%s2503_s7 + $0xc0] sm:$0xff] }
 0x168   : > { %1366 = vmatpush.msrb.mxu3 %v863_v40  ;;  %1308 = vmatpush.msrb.mxu0 %v663_v41  ;;  %v707_v63 = vld [vmem:[%s2487_s22 + $0x6b8] sm:$0xff]  ;;  %v921_v33 = vadd.f32 %v920_v30, %v878_v28  ;;  %v1447_v39 = vld [vmem:[%s2503_s7 + $0x1c0] sm:$0xff] }
 0x169   : > { %1328 = vmatpush.msrb.mxu1 %v727_v42  ;;  %1348 = vmatpush.msrb.mxu2 %v791_v43  ;;  %v771_v0 = vld [vmem:[%s2487_s22 + $0x8b8] sm:$0xff]  ;;  %v960_v42 = vpop.f32.mrf.mxu2  ;;  %v1411_v43 = vld [vmem:[%s2503_s7 + $0xa0] sm:$0xff] }
 0x16a   : > { %1367 = vmatpush.msrb.mxu3 %v859_v44  ;;  %1309 = vmatpush.msrb.mxu0 %v659_v45  ;;  %v839_v1 = vld [vmem:[%s2487_s22 + $0xad8] sm:$0xff]  ;;  %v1443_v44 = vld [vmem:[%s2503_s7 + $0x1a0] sm:$0xff] }
 0x16b   : > { %1329 = vmatpush.msrb.mxu1 %v723_v46  ;;  %1349 = vmatpush.msrb.mxu2 %v787_v47  ;;  %v639_v5 = vld [vmem:[%s2487_s22 + $0x498] sm:$0xff] }
 0x16c   : > { %1368 = vmatpush.msrb.mxu3 %v855_v48  ;;  %1310 = vmatpush.msrb.mxu0 %v655_v49  ;;  %v703_v6 = vld [vmem:[%s2487_s22 + $0x698] sm:$0xff]  ;;  %v1407_v49 = vld [vmem:[%s2503_s7 + $0x80] sm:$0xff] }
 0x16d   : > { %1330 = vmatpush.msrb.mxu1 %v719_v50  ;;  %1350 = vmatpush.msrb.mxu2 %v783_v51  ;;  %v767_v7 = vld [vmem:[%s2487_s22 + $0x898] sm:$0xff]  ;;  %v1439_v50 = vld [vmem:[%s2503_s7 + $0x180] sm:$0xff] }
 0x16e   : > { %1369 = vmatpush.msrb.mxu3 %v851_v52  ;;  %1311 = vmatpush.msrb.mxu0 %v651_v53  ;;  %v835_v8 = vld [vmem:[%s2487_s22 + $0xab8] sm:$0xff] }
 0x16f   : > { %1331 = vmatpush.msrb.mxu1 %v715_v54  ;;  %1351 = vmatpush.msrb.mxu2 %v779_v55  ;;  %v635_v9 = vld [vmem:[%s2487_s22 + $0x478] sm:$0xff]  ;;  %v1403_v55 = vld [vmem:[%s2503_s7 + $0x60] sm:$0xff] }
 0x170   : > { %1370 = vmatpush.msrb.mxu3 %v847_v56  ;;  %1312 = vmatpush.msrb.mxu0 %v647_v57  ;;  %v699_v10 = vld [vmem:[%s2487_s22 + $0x678] sm:$0xff]  ;;  %v1435_v56 = vld [vmem:[%s2503_s7 + $0x160] sm:$0xff]  ;;  %v879_v57 = vperm.slane %v2938_v22, 1 }
 0x171   : > { %1332 = vmatpush.msrb.mxu1 %v711_v58  ;;  %1352 = vmatpush.msrb.mxu2 %v775_v59  ;;  %v763_v61 = vld [vmem:[%s2487_s22 + $0x878] sm:$0xff] }
 0x172   : > { %1371 = vmatpush.msrb.mxu3 %v843_v60  ;;  %1313 = vmatpush.msrb.mxu0 %v643_v62  ;;  %v831_v11 = vld [vmem:[%s2487_s22 + $0xa98] sm:$0xff] }
 0x173   : > { %1333 = vmatpush.msrb.mxu1 %v707_v63  ;;  %1353 = vmatpush.msrb.mxu2 %v771_v0  ;;  %v631_v12 = vld [vmem:[%s2487_s22 + $0x458] sm:$0xff]  ;;  %v1483_v0 = vld [vmem:[%s2503_s7 + $0x2e0] sm:$0xff] }
 0x174   : > { %1372 = vmatpush.msrb.mxu3 %v839_v1  ;;  %1314 = vmatpush.msrb.mxu0 %v639_v5  ;;  %v2034_v13 = vld.sshfl [vmem:[#allocation1] sm:$0xff pattern:$0x73625140]  ;;  %v1399_v1 = vld [vmem:[%s2503_s7 + $0x40] sm:$0xff] }
 0x175   : > { %1334 = vmatpush.msrb.mxu1 %v703_v6  ;;  %1354 = vmatpush.msrb.mxu2 %v767_v7  ;;  %v695_v2 = vld [vmem:[%s2487_s22 + $0x658] sm:$0xff]  ;;  %v1431_v5 = vld [vmem:[%s2503_s7 + $0x140] sm:$0xff] }
 0x176   : > { %1373 = vmatpush.msrb.mxu3 %v835_v8  ;;  %1279 = vmatmul.f32.vlgmr.msra.gmra.mxu2 %v2034_v13  ;;  %v759_v14 = vld [vmem:[%s2487_s22 + $0x858] sm:$0xff]  ;;  %v1395_v13 = vld [vmem:[%s2503_s7 + $0x20] sm:$0xff] }
 0x177   : > { %1315 = vmatpush.msrb.mxu0 %v635_v9  ;;  %1335 = vmatpush.msrb.mxu1 %v699_v10  ;;  %v827_v4 = vld [vmem:[%s2487_s22 + $0xa78] sm:$0xff] }
 0x178   : > { %1355 = vmatpush.msrb.mxu2 %v763_v61  ;;  %1374 = vmatpush.msrb.mxu3 %v831_v11  ;;  %v627_v15 = vld [vmem:[%s2487_s22 + $0x438] sm:$0xff] }
 0x179   : > { %1316 = vmatpush.msrb.mxu0 %v631_v12  ;;  %v691_v16 = vld [vmem:[%s2487_s22 + $0x638] sm:$0xff]  ;;  %1299 = vmatmul.f32.vlgmr.msra.gmra.mxu3 %v2035_v17  ;;  %v980_v48 = vpop.f32.mrf.mxu3  ;;  %v1479_v12 = vld [vmem:[%s2503_s7 + $0x2c0] sm:$0xff] }
 0x17a   : > { %1336 = vmatpush.msrb.mxu1 %v695_v2  ;;  %v755_v18 = vld [vmem:[%s2487_s22 + $0x838] sm:$0xff]  ;;  %1356 = vmatpush.msrb.mxu2 %v759_v14  ;;  %v1427_v2 = vld [vmem:[%s2503_s7 + $0x120] sm:$0xff] }
 0x17b   : > { %v823_v3 = vld [vmem:[%s2487_s22 + $0xa58] sm:$0xff]  ;;  %1375 = vmatpush.msrb.mxu3 %v827_v4  ;;  %1317 = vmatpush.msrb.mxu0 %v627_v15 }
 0x17c   : > { %v623_v19 = vld [vmem:[%s2487_s22 + $0x418] sm:$0xff]  ;;  %1337 = vmatpush.msrb.mxu1 %v691_v16  ;;  %1357 = vmatpush.msrb.mxu2 %v755_v18  ;;  %v1000_v54 = vpop.f32.mrf.mxu0 }
 0x17d   : > { %v687_v20 = vld [vmem:[%s2487_s22 + $0x618] sm:$0xff]  ;;  %1376 = vmatpush.msrb.mxu3 %v823_v3  ;;  %1318 = vmatpush.msrb.mxu0 %v623_v19  ;;  %v1475_v19 = vld [vmem:[%s2503_s7 + $0x2a0] sm:$0xff] }
 0x17e   : > { %v751_v23 = vld [vmem:[%s2487_s22 + $0x818] sm:$0xff]  ;;  %1338 = vmatpush.msrb.mxu1 %v687_v20  ;;  %1319 = vmatmul.f32.vlgmr.msrb.gmra.mxu0 %v2036_v34  ;;  %v1391_v20 = vld [vmem:[%s2503_s7] sm:$0xff]  ;;  %v1420_v34 = vld [vmem:[%s2503_s7 + $0xe8] sm:$0xff] }
 0x17f   : > { %v819_v24 = vld [vmem:[%s2487_s22 + $0xa38] sm:$0xff]  ;;  %1358 = vmatpush.msrb.mxu2 %v751_v23  ;;  %1339 = vmatmul.f32.vlgmr.msrb.gmra.mxu1 %v2037_v37  ;;  %v1423_v23 = vld [vmem:[%s2503_s7 + $0x100] sm:$0xff]  ;;  %v1450_v37 = vld [vmem:[%s2503_s7 + $0x1d8] sm:$0xff] }
 0x180   : > { %v1421_v25 = vld [vmem:[%s2503_s7 + $0xf0] sm:$0xff]  ;;  %1377 = vmatpush.msrb.mxu3 %v819_v24  ;;  %1359 = vmatmul.f32.vlgmr.msrb.gmra.mxu2 %v2681_v21  ;;  %v940_v21 = vpop.f32.mrf.mxu1 }
 0x181   : > { %v1453_v27 = vld [vmem:[%s2503_s7 + $0x1f0] sm:$0xff]  ;;  %1525 = vmatpush.msra.mxu0 %v1421_v25  ;;  %v941_v40 = vadd.f32 %v940_v21, %v921_v33  ;;  %v1454_v25 = vld [vmem:[%s2503_s7 + $0x1f8] sm:$0xff] }
 0x182   : > { %v815_v29 = vld [vmem:[%s2487_s22 + $0xa18] sm:$0xff]  ;;  %1545 = vmatpush.msra.mxu1 %v1453_v27 }
 0x183   : > { %1378 = vmatpush.msrb.mxu3 %v815_v29  ;;  %v1417_v35 = vld [vmem:[%s2503_s7 + $0xd0] sm:$0xff]  ;;  %1526 = vmatpush.msra.mxu0 %v1419_v31  ;;  %v961_v45 = vadd.f32 %v960_v42, %v941_v40  ;;  %v1422_v31 = vld [vmem:[%s2503_s7 + $0xf8] sm:$0xff]  ;;  %v1467_v40 = vld [vmem:[%s2503_s7 + $0x260] sm:$0xff] }
 0x184   : > { %1379 = vmatmul.f32.vlgmr.msrb.gmra.mxu3 %v2687_v26  ;;  %v1449_v36 = vld [vmem:[%s2503_s7 + $0x1d0] sm:$0xff]  ;;  %1546 = vmatpush.msra.mxu1 %v1451_v32  ;;  %v1452_v32 = vld [vmem:[%s2503_s7 + $0x1e8] sm:$0xff] }
 0x185   : > { %1527 = vmatpush.msra.mxu0 %v1417_v35  ;;  %v1413_v41 = vld [vmem:[%s2503_s7 + $0xb0] sm:$0xff]  ;;  %v981_v51 = vadd.f32 %v980_v48, %v961_v45  ;;  %v1416_v42 = vld [vmem:[%s2503_s7 + $0xc8] sm:$0xff]  ;;  %v1463_v48 = vld [vmem:[%s2503_s7 + $0x240] sm:$0xff] }
 0x186   : > { %1547 = vmatpush.msra.mxu1 %v1449_v36  ;;  %v1445_v26 = vld [vmem:[%s2503_s7 + $0x1b0] sm:$0xff]  ;;  %v1471_v36 = vld [vmem:[%s2503_s7 + $0x280] sm:$0xff] }
 0x187   : > { %1528 = vmatpush.msra.mxu0 %v1415_v38  ;;  %v1409_v46 = vld [vmem:[%s2503_s7 + $0x90] sm:$0xff]  ;;  %v1001_v59 = vadd.f32 %v1000_v54, %v981_v51  ;;  %v1459_v54 = vld [vmem:[%s2503_s7 + $0x220] sm:$0xff] }
 0x188   : > { %1548 = vmatpush.msra.mxu1 %v1447_v39  ;;  %v1441_v47 = vld [vmem:[%s2503_s7 + $0x190] sm:$0xff]  ;;  %v1020_v63 = vpop.f32.mrf.mxu1  ;;  %v1418_v39 = vld [vmem:[%s2503_s7 + $0xd8] sm:$0xff] }
 0x189   : > { %1529 = vmatpush.msra.mxu0 %v1413_v41  ;;  %v1405_v52 = vld [vmem:[%s2503_s7 + $0x70] sm:$0xff]  ;;  %v1021_v9 = vadd.f32 %v1020_v63, %v1001_v59  ;;  %v1448_v41 = vld [vmem:[%s2503_s7 + $0x1c8] sm:$0xff]  ;;  %v1486_v63 = vld [vmem:[%s2503_s7 + $0x2f8] sm:$0xff] }
 0x18a   : > { %1549 = vmatpush.msra.mxu1 %v1445_v26  ;;  %v1437_v53 = vld [vmem:[%s2503_s7 + $0x170] sm:$0xff]  ;;  %v1436_v59 = vld [vmem:[%s2503_s7 + $0x168] sm:$0xff] }
 0x18b   : > { %1530 = vmatpush.msra.mxu0 %v1411_v43  ;;  %v1485_v58 = vld [vmem:[%s2503_s7 + $0x2f0] sm:$0xff]  ;;  %v1383_v16 = vmul.f32 0.2, %v1021_v9  ;;  %v1446_v43 = vld [vmem:[%s2503_s7 + $0x1b8] sm:$0xff] }
 0x18c   : > { %1550 = vmatpush.msra.mxu1 %v1443_v44  ;;  %v1401_v60 = vld [vmem:[%s2503_s7 + $0x50] sm:$0xff]  ;;  %1565 = vmatpush.msra.mxu2 %v1485_v58  ;;  %v1406_v58 = vld [vmem:[%s2503_s7 + $0x78] sm:$0xff] }
 0x18d   : > { %1531 = vmatpush.msra.mxu0 %v1409_v46  ;;  %v1433_v62 = vld [vmem:[%s2503_s7 + $0x150] sm:$0xff]  ;;  %v2987_v30 = vmax.f32 %v1021_v9, %v1383_v16  ;;  %v1414_v46 = vld [vmem:[%s2503_s7 + $0xb8] sm:$0xff]  ;;  %v1511_v16 = vld [vmem:[%s2503_s7 + $0x3c0] sm:$0xff] }
 0x18e   : > { %1551 = vmatpush.msra.mxu1 %v1441_v47  ;;  %1566 = vmatpush.msra.mxu2 %v1483_v0  ;;  %v1481_v8 = vld [vmem:[%s2503_s7 + $0x2d0] sm:$0xff]  ;;  %v1444_v47 = vld [vmem:[%s2503_s7 + $0x1a8] sm:$0xff]  ;;  %v1434_v0 = vld [vmem:[%s2503_s7 + $0x158] sm:$0xff] }
 0x18f   : > { %1532 = vmatpush.msra.mxu0 %v1407_v49  ;;  %v1397_v10 = vld [vmem:[%s2503_s7 + $0x30] sm:$0xff]  ;;  %v1412_v49 = vld [vmem:[%s2503_s7 + $0xa8] sm:$0xff]  ;;  %v1482_v9 = vld [vmem:[%s2503_s7 + $0x2d8] sm:$0xff] }
 0x190   : > { %1552 = vmatpush.msra.mxu1 %v1439_v50  ;;  %v1429_v61 = vld [vmem:[%s2503_s7 + $0x130] sm:$0xff]  ;;  %1567 = vmatpush.msra.mxu2 %v1481_v8  ;;  %v1442_v50 = vld [vmem:[%s2503_s7 + $0x198] sm:$0xff]  ;;  %v1400_v8 = vld [vmem:[%s2503_s7 + $0x48] sm:$0xff] }
 0x191   : > { %1533 = vmatpush.msra.mxu0 %v1405_v52  ;;  %v1477_v15 = vld [vmem:[%s2503_s7 + $0x2b0] sm:$0xff]  ;;  %v1410_v52 = vld [vmem:[%s2503_s7 + $0x98] sm:$0xff] }
 0x192   : > { %1553 = vmatpush.msra.mxu1 %v1437_v53  ;;  %1568 = vmatpush.msra.mxu2 %v1479_v12  ;;  %v1393_v17 = vld [vmem:[%s2503_s7 + $0x10] sm:$0xff]  ;;  %v1440_v53 = vld [vmem:[%s2503_s7 + $0x188] sm:$0xff] }
 0x193   : > { %1534 = vmatpush.msra.mxu0 %v1403_v55  ;;  %v1040_v6 = vpop.f32.mrf.mxu2  ;;  %v1425_v18 = vld [vmem:[%s2503_s7 + $0x110] sm:$0xff]  ;;  %v1408_v55 = vld [vmem:[%s2503_s7 + $0x88] sm:$0xff] }
 0x194   : > { %1554 = vmatpush.msra.mxu1 %v1435_v56  ;;  %v1041_v7 = vadd.f32 %v1040_v6, %v879_v57  ;;  %1569 = vmatpush.msra.mxu2 %v1477_v15  ;;  %v1473_v29 = vld [vmem:[%s2503_s7 + $0x290] sm:$0xff]  ;;  %v1438_v56 = vld [vmem:[%s2503_s7 + $0x178] sm:$0xff]  ;;  %v1480_v12 = vld [vmem:[%s2503_s7 + $0x2c8] sm:$0xff] }
 0x195   : > { %1535 = vmatpush.msra.mxu0 %v1401_v60  ;;  %v1469_v21 = vld [vmem:[%s2503_s7 + $0x270] sm:$0xff]  ;;  %v1455_v60 = vld [vmem:[%s2503_s7 + $0x200] sm:$0xff]  ;;  %v1426_v15 = vld [vmem:[%s2503_s7 + $0x118] sm:$0xff] }
 0x196   : > { %1555 = vmatpush.msra.mxu1 %v1433_v62  ;;  %v1060_v11 = vpop.f32.mrf.mxu3  ;;  %1570 = vmatpush.msra.mxu2 %v1475_v19  ;;  %v1465_v45 = vld [vmem:[%s2503_s7 + $0x250] sm:$0xff]  ;;  %v1404_v62 = vld [vmem:[%s2503_s7 + $0x68] sm:$0xff] }
 0x197   : > { %1536 = vmatpush.msra.mxu0 %v1399_v1  ;;  %v1061_v14 = vadd.f32 %v1060_v11, %v1041_v7  ;;  %v1461_v51 = vld [vmem:[%s2503_s7 + $0x230] sm:$0xff]  ;;  %v1402_v1 = vld [vmem:[%s2503_s7 + $0x58] sm:$0xff]  ;;  %v1432_v7 = vld [vmem:[%s2503_s7 + $0x148] sm:$0xff] }
 0x198   : > { %1556 = vmatpush.msra.mxu1 %v1431_v5  ;;  %1571 = vmatpush.msra.mxu2 %v1473_v29  ;;  %v1457_v57 = vld [vmem:[%s2503_s7 + $0x210] sm:$0xff]  ;;  %v1484_v5 = vld [vmem:[%s2503_s7 + $0x2e8] sm:$0xff]  ;;  %v1398_v11 = vld [vmem:[%s2503_s7 + $0x38] sm:$0xff] }
 0x199   : > { %1537 = vmatpush.msra.mxu0 %v1397_v10  ;;  %v1080_v4 = vpop.f32.mrf.mxu0  ;;  %v1517_v6 = vld [vmem:[%s2503_s7 + $0x3f0] sm:$0xff]  ;;  %v1430_v10 = vld [vmem:[%s2503_s7 + $0x138] sm:$0xff]  ;;  %v1392_v19 = vld [vmem:[%s2503_s7 + $0x8] sm:$0xff] }
 0x19a   : > { %1557 = vmatpush.msra.mxu1 %v1429_v61  ;;  %v1081_v3 = vadd.f32 %v1080_v4, %v1061_v14  ;;  %1572 = vmatpush.msra.mxu2 %v1471_v36  ;;  %v1515_v61 = vld [vmem:[%s2503_s7 + $0x3e0] sm:$0xff]  ;;  %v1396_v14 = vld [vmem:[%s2503_s7 + $0x28] sm:$0xff]  ;;  %v1478_v4 = vld [vmem:[%s2503_s7 + $0x2b8] sm:$0xff] }
 0x19b   : > { %1538 = vmatpush.msra.mxu0 %v1395_v13  ;;  %1585 = vmatpush.msra.mxu3 %v1517_v6  ;;  %v1428_v13 = vld [vmem:[%s2503_s7 + $0x128] sm:$0xff]  ;;  %v1497_v36 = vld [vmem:[%s2503_s7 + $0x350] sm:$0xff]  ;;  %v1502_v6 = vld [vmem:[%s2503_s7 + $0x378] sm:$0xff] }
 0x19c   : > { %1558 = vmatpush.msra.mxu1 %v1427_v2  ;;  %v1100_v24 = vpop.f32.mrf.mxu1  ;;  %v1120_v28 = vpop.f32.mrf.mxu2  ;;  %1573 = vmatpush.msra.mxu2 %v1469_v21  ;;  %v1513_v2 = vld [vmem:[%s2503_s7 + $0x3d0] sm:$0xff]  ;;  %v1468_v29 = vld [vmem:[%s2503_s7 + $0x268] sm:$0xff] }
 0x19d   : > { %1539 = vmatpush.msra.mxu0 %v1393_v17  ;;  %v1101_v27 = vadd.f32 %v1100_v24, %v1081_v3  ;;  %1586 = vmatpush.msra.mxu3 %v1515_v61  ;;  %v1394_v17 = vld [vmem:[%s2503_s7 + $0x18] sm:$0xff]  ;;  %v1424_v3 = vld [vmem:[%s2503_s7 + $0x108] sm:$0xff] }
 0x19e   : > { %1559 = vmatpush.msra.mxu1 %v1425_v18  ;;  %1574 = vmatpush.msra.mxu2 %v1467_v40  ;;  %v1476_v18 = vld [vmem:[%s2503_s7 + $0x2a8] sm:$0xff]  ;;  %v880_v40 = vperm.slane %v2938_v22, 2 }
 0x19f   : > { %1540 = vmatpush.msra.mxu0 %v1391_v20  ;;  %v1121_v33 = vadd.f32 %v1120_v28, %v1101_v27  ;;  %v1140_v35 = vpop.f32.mrf.mxu3  ;;  %1587 = vmatpush.msra.mxu3 %v1513_v2  ;;  %v1509_v20 = vld [vmem:[%s2503_s7 + $0x3b0] sm:$0xff]  ;;  %v1472_v24 = vld [vmem:[%s2503_s7 + $0x288] sm:$0xff]  ;;  %v1470_v27 = vld [vmem:[%s2503_s7 + $0x278] sm:$0xff] }
 0x1a0   : > { %1560 = vmatpush.msra.mxu1 %v1423_v23  ;;  %1541 = vmatmul.f32.vlgmr.msra.gmra.mxu0 %v2987_v30  ;;  %v1474_v23 = vld [vmem:[%s2503_s7 + $0x298] sm:$0xff]  ;;  %v1505_v28 = vld [vmem:[%s2503_s7 + $0x390] sm:$0xff]  ;;  %v1460_v21 = vld [vmem:[%s2503_s7 + $0x228] sm:$0xff] }
 0x1a1   : > { %1605 = vmatpush.msrb.mxu0 %v1422_v31  ;;  %v1141_v38 = vadd.f32 %v1140_v35, %v1121_v33  ;;  %1575 = vmatpush.msra.mxu2 %v1465_v45  ;;  %v1503_v31 = vld [vmem:[%s2503_s7 + $0x380] sm:$0xff]  ;;  %v1501_v33 = vld [vmem:[%s2503_s7 + $0x370] sm:$0xff]  ;;  %v1462_v35 = vld [vmem:[%s2503_s7 + $0x238] sm:$0xff] }
 0x1a2   : > { %1625 = vmatpush.msrb.mxu1 %v1454_v25  ;;  %1588 = vmatpush.msra.mxu3 %v1511_v16  ;;  %v1507_v25 = vld [vmem:[%s2503_s7 + $0x3a0] sm:$0xff]  ;;  %v1492_v61 = vld [vmem:[%s2503_s7 + $0x328] sm:$0xff] }
 0x1a3   : > { %1606 = vmatpush.msrb.mxu0 %v1420_v34  ;;  %v1384_v26 = vmul.f32 0.2, %v1141_v38  ;;  %1576 = vmatpush.msra.mxu2 %v1463_v48  ;;  %v1499_v34 = vld [vmem:[%s2503_s7 + $0x360] sm:$0xff] }
 0x1a4   : > { %1626 = vmatpush.msrb.mxu1 %v1452_v32  ;;  %1589 = vmatpush.msra.mxu3 %v1509_v20  ;;  %v1466_v32 = vld [vmem:[%s2503_s7 + $0x258] sm:$0xff]  ;;  %v1487_v45 = vld [vmem:[%s2503_s7 + $0x300] sm:$0xff] }
 0x1a5   : > { %1607 = vmatpush.msrb.mxu0 %v1418_v39  ;;  %v3001_v44 = vmax.f32 %v1141_v38, %v1384_v26  ;;  %1577 = vmatpush.msra.mxu2 %v1461_v51  ;;  %v1458_v38 = vld [vmem:[%s2503_s7 + $0x218] sm:$0xff]  ;;  %v1493_v39 = vld [vmem:[%s2503_s7 + $0x330] sm:$0xff]  ;;  %v1491_v26 = vld [vmem:[%s2503_s7 + $0x320] sm:$0xff] }
 0x1a6   : > { %1627 = vmatpush.msrb.mxu1 %v1450_v37  ;;  %1590 = vmatpush.msra.mxu3 %v1507_v25  ;;  %v1495_v37 = vld [vmem:[%s2503_s7 + $0x340] sm:$0xff] }
 0x1a7   : > { %1608 = vmatpush.msrb.mxu0 %v1416_v42  ;;  %1561 = vmatmul.f32.vlgmr.msra.gmra.mxu1 %v3001_v44 }
 0x1a8   : > { %1628 = vmatpush.msrb.mxu1 %v1448_v41  ;;  %1578 = vmatpush.msra.mxu2 %v1459_v54  ;;  %v1456_v41 = vld [vmem:[%s2503_s7 + $0x208] sm:$0xff] }
 0x1a9   : > { %1609 = vmatpush.msrb.mxu0 %v1414_v46  ;;  %1591 = vmatpush.msra.mxu3 %v1505_v28  ;;  %v1703_v28 = vld [vmem:[%s2512_s1 + $0x70] sm:$0xff] }
 0x1aa   : > { %1629 = vmatpush.msrb.mxu1 %v1446_v43  ;;  %1579 = vmatpush.msra.mxu2 %v1457_v57  ;;  %v1489_v43 = vld [vmem:[%s2503_s7 + $0x310] sm:$0xff] }
 0x1ab   : > { %1610 = vmatpush.msrb.mxu0 %v1412_v49  ;;  %1592 = vmatpush.msra.mxu3 %v1503_v31  ;;  %v1702_v31 = vld [vmem:[%s2512_s1 + $0x68] sm:$0xff] }
 0x1ac   : > { %1630 = vmatpush.msrb.mxu1 %v1444_v47  ;;  %1580 = vmatpush.msra.mxu2 %v1455_v60  ;;  %v1518_v47 = vld [vmem:[%s2503_s7 + $0x3f8] sm:$0xff] }
 0x1ad   : > { %1611 = vmatpush.msrb.mxu0 %v1410_v52  ;;  %1593 = vmatpush.msra.mxu3 %v1501_v33  ;;  %v1510_v60 = vld [vmem:[%s2503_s7 + $0x3b8] sm:$0xff]  ;;  %v1718_v33 = vld [vmem:[%s2512_s1 + $0xe8] sm:$0xff] }
 0x1ae   : > { %1631 = vmatpush.msrb.mxu1 %v1442_v50  ;;  %1645 = vmatpush.msrb.mxu2 %v1486_v63  ;;  %v1516_v50 = vld [vmem:[%s2503_s7 + $0x3e8] sm:$0xff] }
 0x1af   : > { %1612 = vmatpush.msrb.mxu0 %v1408_v55  ;;  %1594 = vmatpush.msra.mxu3 %v1499_v34  ;;  %v1508_v63 = vld [vmem:[%s2503_s7 + $0x3a8] sm:$0xff] }
 0x1b0   : > { %1632 = vmatpush.msrb.mxu1 %v1440_v53  ;;  %1646 = vmatpush.msrb.mxu2 %v1484_v5  ;;  %v1514_v53 = vld [vmem:[%s2503_s7 + $0x3d8] sm:$0xff]  ;;  %v1504_v5 = vld [vmem:[%s2503_s7 + $0x388] sm:$0xff] }
 0x1b1   : > { %1613 = vmatpush.msrb.mxu0 %v1406_v58  ;;  %1595 = vmatpush.msra.mxu3 %v1497_v36  ;;  %v1717_v34 = vld [vmem:[%s2512_s1 + $0xe0] sm:$0xff]  ;;  %v1716_v36 = vld [vmem:[%s2512_s1 + $0xd8] sm:$0xff] }
 0x1b2   : > { %1633 = vmatpush.msrb.mxu1 %v1438_v56  ;;  %1647 = vmatpush.msrb.mxu2 %v1482_v9  ;;  %v1512_v56 = vld [vmem:[%s2503_s7 + $0x3c8] sm:$0xff] }
 0x1b3   : > { %1614 = vmatpush.msrb.mxu0 %v1404_v62  ;;  %1596 = vmatpush.msra.mxu3 %v1495_v37  ;;  %v1496_v9 = vld [vmem:[%s2503_s7 + $0x348] sm:$0xff]  ;;  %v1715_v37 = vld [vmem:[%s2512_s1 + $0xd0] sm:$0xff] }
 0x1b4   : > { %1634 = vmatpush.msrb.mxu1 %v1436_v59  ;;  %1648 = vmatpush.msrb.mxu2 %v1480_v12  ;;  %v1488_v12 = vld [vmem:[%s2503_s7 + $0x308] sm:$0xff] }
 0x1b5   : > { %1615 = vmatpush.msrb.mxu0 %v1402_v1  ;;  %1597 = vmatpush.msra.mxu3 %v1493_v39  ;;  %v1506_v1 = vld [vmem:[%s2503_s7 + $0x398] sm:$0xff]  ;;  %v1714_v39 = vld [vmem:[%s2512_s1 + $0xc8] sm:$0xff] }
 0x1b6   : > { %1635 = vmatpush.msrb.mxu1 %v1434_v0  ;;  %1649 = vmatpush.msrb.mxu2 %v1478_v4 }
 0x1b7   : > { %1616 = vmatpush.msrb.mxu0 %v1400_v8  ;;  %1598 = vmatpush.msra.mxu3 %v1491_v26  ;;  %v1498_v8 = vld [vmem:[%s2503_s7 + $0x358] sm:$0xff] }
 0x1b8   : > { %1636 = vmatpush.msrb.mxu1 %v1432_v7  ;;  %1650 = vmatpush.msrb.mxu2 %v1476_v18  ;;  %v1500_v7 = vld [vmem:[%s2503_s7 + $0x368] sm:$0xff]  ;;  %v1696_v26 = vld [vmem:[%s2512_s1 + $0x38] sm:$0xff] }
 0x1b9   : > { %1617 = vmatpush.msrb.mxu0 %v1398_v11  ;;  %1599 = vmatpush.msra.mxu3 %v1489_v43  ;;  %v1490_v11 = vld [vmem:[%s2503_s7 + $0x318] sm:$0xff]  ;;  %v1694_v43 = vld [vmem:[%s2512_s1 + $0x28] sm:$0xff] }
 0x1ba   : > { %1637 = vmatpush.msrb.mxu1 %v1430_v10  ;;  %1651 = vmatpush.msrb.mxu2 %v1474_v23  ;;  %v1494_v10 = vld [vmem:[%s2503_s7 + $0x338] sm:$0xff] }
 0x1bb   : > { %1618 = vmatpush.msrb.mxu0 %v1396_v14  ;;  %1600 = vmatpush.msra.mxu3 %v1487_v45  ;;  %v1692_v45 = vld [vmem:[%s2512_s1 + $0x18] sm:$0xff] }
 0x1bc   : > { %1638 = vmatpush.msrb.mxu1 %v1428_v13  ;;  %1652 = vmatpush.msrb.mxu2 %v1472_v24  ;;  %v881_v13 = vperm.slane %v2938_v22, 3 }
 0x1bd   : > { %1619 = vmatpush.msrb.mxu0 %v1394_v17  ;;  %1665 = vmatpush.msrb.mxu3 %v1518_v47  ;;  %v1691_v47 = vld [vmem:[%s2512_s1 + $0x10] sm:$0xff] }
 0x1be   : > { %1639 = vmatpush.msrb.mxu1 %v1426_v15  ;;  %1653 = vmatpush.msrb.mxu2 %v1470_v27  ;;  %v1704_v27 = vld [vmem:[%s2512_s1 + $0x78] sm:$0xff] }
 0x1bf   : > { %1620 = vmatpush.msrb.mxu0 %v1392_v19  ;;  %1666 = vmatpush.msrb.mxu3 %v1516_v50  ;;  %v1710_v50 = vld [vmem:[%s2512_s1 + $0xa8] sm:$0xff] }
 0x1c0   : > { %1640 = vmatpush.msrb.mxu1 %v1424_v3  ;;  %1621 = vmatmul.f32.vlgmr.msrb.gmra.mxu0 %v2987_v30  ;;  %v1464_v30 = vld [vmem:[%s2503_s7 + $0x248] sm:$0xff] }
 0x1c1   : > { %1641 = vmatmul.f32.vlgmr.msrb.gmra.mxu1 %v3001_v44  ;;  %1654 = vmatpush.msrb.mxu2 %v1468_v29  ;;  %v1720_v29 = vld [vmem:[%s2512_s1 + $0xf8] sm:$0xff] }
 0x1c2   : > { %1667 = vmatpush.msrb.mxu3 %v1514_v53  ;;  %1725 = vmatpush.msra.mxu0 %v1704_v27  ;;  %v1708_v53 = vld [vmem:[%s2512_s1 + $0x98] sm:$0xff] }
 0x1c3   : > { %1655 = vmatpush.msrb.mxu2 %v1466_v32  ;;  %1745 = vmatpush.msra.mxu1 %v1720_v29  ;;  %v1719_v32 = vld [vmem:[%s2512_s1 + $0xf0] sm:$0xff] }
 0x1c4   : > { %1668 = vmatpush.msrb.mxu3 %v1512_v56  ;;  %1726 = vmatpush.msra.mxu0 %v1703_v28  ;;  %v1705_v56 = vld [vmem:[%s2512_s1 + $0x80] sm:$0xff] }
 0x1c5   : > { %1656 = vmatpush.msrb.mxu2 %v1464_v30  ;;  %v1701_v30 = vld [vmem:[%s2512_s1 + $0x60] sm:$0xff]  ;;  %1746 = vmatpush.msra.mxu1 %v1719_v32 }
 0x1c6   : > { %1669 = vmatpush.msrb.mxu3 %v1510_v60  ;;  %1727 = vmatpush.msra.mxu0 %v1702_v31 }
 0x1c7   : > { %1657 = vmatpush.msrb.mxu2 %v1462_v35  ;;  %v1700_v35 = vld [vmem:[%s2512_s1 + $0x58] sm:$0xff]  ;;  %1747 = vmatpush.msra.mxu1 %v1718_v33 }
 0x1c8   : > { %1670 = vmatpush.msrb.mxu3 %v1508_v63  ;;  %1728 = vmatpush.msra.mxu0 %v1701_v30 }
 0x1c9   : > { %1658 = vmatpush.msrb.mxu2 %v1460_v21  ;;  %v1699_v21 = vld [vmem:[%s2512_s1 + $0x50] sm:$0xff]  ;;  %1748 = vmatpush.msra.mxu1 %v1717_v34 }
 0x1ca   : > { %1671 = vmatpush.msrb.mxu3 %v1506_v1  ;;  %1729 = vmatpush.msra.mxu0 %v1700_v35 }
 0x1cb   : > { %1659 = vmatpush.msrb.mxu2 %v1458_v38  ;;  %v1698_v38 = vld [vmem:[%s2512_s1 + $0x48] sm:$0xff]  ;;  %1749 = vmatpush.msra.mxu1 %v1716_v36 }
 0x1cc   : > { %1672 = vmatpush.msrb.mxu3 %v1504_v5  ;;  %1730 = vmatpush.msra.mxu0 %v1699_v21 }
 0x1cd   : > { %1660 = vmatpush.msrb.mxu2 %v1456_v41  ;;  %1750 = vmatpush.msra.mxu1 %v1715_v37  ;;  %v1713_v41 = vld [vmem:[%s2512_s1 + $0xc0] sm:$0xff] }
 0x1ce   : > { %1673 = vmatpush.msrb.mxu3 %v1502_v6  ;;  %1731 = vmatpush.msra.mxu0 %v1698_v38 }
 0x1cf   : > { %1751 = vmatpush.msra.mxu1 %v1714_v39 }
 0x1d0   : > { %1674 = vmatpush.msrb.mxu3 %v1500_v7 }
 0x1d1   : > { %v1160_v42 = vpop.f32.mrf.mxu0  ;;  %1752 = vmatpush.msra.mxu1 %v1713_v41 }
 0x1d2   : > { %v1161_v44 = vadd.f32 %v1160_v42, %v880_v40  ;;  %1675 = vmatpush.msrb.mxu3 %v1498_v8  ;;  %v1697_v40 = vld [vmem:[%s2512_s1 + $0x40] sm:$0xff]  ;;  %v1695_v42 = vld [vmem:[%s2512_s1 + $0x30] sm:$0xff] }
 0x1d3   : > { %1732 = vmatpush.msra.mxu0 %v1697_v40 }
 0x1d4   : > { %v1180_v46 = vpop.f32.mrf.mxu1  ;;  %v1200_v49 = vpop.f32.mrf.mxu2  ;;  %1676 = vmatpush.msrb.mxu3 %v1496_v9 }
 0x1d5   : > { %v1181_v48 = vadd.f32 %v1180_v46, %v1161_v44  ;;  %1733 = vmatpush.msra.mxu0 %v1696_v26  ;;  %v1693_v44 = vld [vmem:[%s2512_s1 + $0x20] sm:$0xff]  ;;  %v1712_v46 = vld [vmem:[%s2512_s1 + $0xb8] sm:$0xff] }
 0x1d6   : > { %1677 = vmatpush.msrb.mxu3 %v1494_v10  ;;  %1753 = vmatpush.msra.mxu1 %v1712_v46 }
 0x1d7   : > { %v1201_v51 = vadd.f32 %v1200_v49, %v1181_v48  ;;  %v1220_v52 = vpop.f32.mrf.mxu3  ;;  %1734 = vmatpush.msra.mxu0 %v1695_v42  ;;  %v1711_v48 = vld [vmem:[%s2512_s1 + $0xb0] sm:$0xff]  ;;  %v1690_v49 = vld [vmem:[%s2512_s1 + $0x8] sm:$0xff] }
 0x1d8   : > { %1678 = vmatpush.msrb.mxu3 %v1492_v61  ;;  %1754 = vmatpush.msra.mxu1 %v1711_v48 }
 0x1d9   : > { %v1221_v54 = vadd.f32 %v1220_v52, %v1201_v51  ;;  %1735 = vmatpush.msra.mxu0 %v1694_v43  ;;  %v1689_v51 = vld [vmem:[%s2512_s1] sm:$0xff] }
 0x1da   : > { %v1240_v55 = vpop.f32.mrf.mxu0  ;;  %1679 = vmatpush.msrb.mxu3 %v1490_v11  ;;  %1755 = vmatpush.msra.mxu1 %v1710_v50  ;;  %v1709_v52 = vld [vmem:[%s2512_s1 + $0xa0] sm:$0xff] }
 0x1db   : > { %v1241_v57 = vadd.f32 %v1240_v55, %v1221_v54  ;;  %1736 = vmatpush.msra.mxu0 %v1693_v44  ;;  %v1707_v54 = vld [vmem:[%s2512_s1 + $0x90] sm:$0xff]  ;;  %v1706_v55 = vld [vmem:[%s2512_s1 + $0x88] sm:$0xff] }
 0x1dc   : > { %1680 = vmatpush.msrb.mxu3 %v1488_v12  ;;  %1756 = vmatpush.msra.mxu1 %v1709_v52 }
 0x1dd   : > { %v1260_v58 = vpop.f32.mrf.mxu1  ;;  %1737 = vmatpush.msra.mxu0 %v1692_v45 }
 0x1de   : > { %v1261_v59 = vadd.f32 %v1260_v58, %v1241_v57  ;;  %1757 = vmatpush.msra.mxu1 %v1708_v53  ;;  %v1519_v57 = vld [vmem:[%s2505_s20] sm:$0x3] }
 0x1df   : > { %1738 = vmatpush.msra.mxu0 %v1691_v47  ;;  %v1522_v1 = vperm.slane %v1519_v57, 1 }
 0x1e0   : > { %v1385_v62 = vmul.f32 0.2, %v1261_v59  ;;  %1758 = vmatpush.msra.mxu1 %v1707_v54 }
 0x1e1   : > { %1739 = vmatpush.msra.mxu0 %v1690_v49 }
 0x1e2   : > { %v1389_v0 = vmax.f32 %v1261_v59, %v1385_v62  ;;  %1759 = vmatpush.msra.mxu1 %v1706_v55  ;;  %v1521_v59 = vperm.slane %v1519_v57, 0 }
 0x1e3   : > { %1740 = vmatpush.msra.mxu0 %v1689_v51 }
 0x1e4   : > { %1581 = vmatmul.f32.vlgmr.msra.gmra.mxu2 %v1389_v0  ;;  %1760 = vmatpush.msra.mxu1 %v1705_v56 }
 0x1ec   : > { %1661 = vmatmul.f32.vlgmr.msrb.gmra.mxu2 %v1389_v0 }
 0x1f9   : > { %v1280_v2 = vpop.f32.mrf.mxu2 }
 0x1fa   : > { %v1281_v14 = vadd.f32 %v1280_v2, %v881_v13 }
 0x1fb   : > { %v1320_v16 = vpop.f32.mrf.mxu0 }
 0x1fc   : > { %v1300_v4 = vpop.f32.mrf.mxu3  ;;  %v1340_v18 = vpop.f32.mrf.mxu1 }
 0x1fd   : > { %v1301_v15 = vadd.f32 %v1300_v4, %v1281_v14 }
 0x1ff   : > { %v1321_v17 = vadd.f32 %v1320_v16, %v1301_v15 }
 0x201   : > { %v1341_v3 = vadd.f32 %v1340_v18, %v1321_v17  ;;  %v2033_v17 = vld [vmem:[%s431_s15] ss:$0 sm:$0xff] }
 0x203   : > { %v1360_v19 = vpop.f32.mrf.mxu2 }
 0x204   : > { %v1361_v20 = vadd.f32 %v1360_v19, %v1341_v3 }
 0x207   : > { %v1380_v23 = vpop.f32.mrf.mxu3 }
 0x208   : > { %v1381_v24 = vadd.f32 %v1380_v23, %v1361_v20 }
 0x20a   : > { %v1386_v22 = vmul.f32 0.2, %v1381_v24 }
 0x20c   : > { %v1390_v25 = vmax.f32 %v1381_v24, %v1386_v22 }
 0x20e   : > { %1601 = vmatmul.f32.vlgmr.msra.gmra.mxu3 %v1390_v25 }
 0x216   : > { %1681 = vmatmul.f32.vlgmr.msrb.gmra.mxu3 %v1390_v25 }
 0x21d   : > { %v1542_v58 = vpop.f32.mrf.mxu0 }
 0x21e   : > { %v1543_v63 = vadd.f32 %v1542_v58, %v1521_v59 }
 0x224   : > { %v1562_v60 = vpop.f32.mrf.mxu1 }
 0x225   : > { %v1563_v0 = vadd.f32 %v1562_v60, %v1543_v63 }
 0x23d   : > { %v1622_v5 = vpop.f32.mrf.mxu0 }
 0x23e   : > { %v1623_v8 = vadd.f32 %v1622_v5, %v1522_v1  ;;  %v1642_v61 = vpop.f32.mrf.mxu1 }
 0x240   : > { %v1643_v12 = vadd.f32 %v1642_v61, %v1623_v8 }
 0x267   : > { %v1582_v62 = vpop.f32.mrf.mxu2 }
 0x268   : > { %v1583_v6 = vadd.f32 %v1582_v62, %v1563_v0 }
 0x26f   : > { %v1662_v11 = vpop.f32.mrf.mxu2 }
 0x270   : > { %v1663_v2 = vadd.f32 %v1662_v11, %v1643_v12 }
 0x291   : > { %v1602_v7 = vpop.f32.mrf.mxu3 }
 0x292   : > { %v1603_v9 = vadd.f32 %v1602_v7, %v1583_v6 }
 0x294   : > { %v1685_v10 = vmul.f32 0.2, %v1603_v9 }
 0x296   : > { %v1687_v13 = vmax.f32 %v1603_v9, %v1685_v10 }
 0x298   : > { %1741 = vmatmul.f32.vlgmr.msra.gmra.mxu0 %v1687_v13 }
 0x299   : > { %v1682_v14 = vpop.f32.mrf.mxu3 }
 0x29a   : > { %v1683_v4 = vadd.f32 %v1682_v14, %v1663_v2 }
 0x29c   : > { %v1686_v15 = vmul.f32 0.2, %v1683_v4 }
 0x29e   : > { %v1688_v16 = vmax.f32 %v1683_v4, %v1686_v15 }
 0x2a0   : > { %1761 = vmatmul.f32.vlgmr.msra.gmra.mxu1 %v1688_v16 }
 0x315   : > { %v1742_v18 = vpop.f32.mrf.mxu0 }
 0x316   : > { %v1743_v3 = vadd.f32 %v2033_v17, %v1742_v18 }
 0x31d   : > { %v1762_v19 = vpop.f32.mrf.mxu1 }
 0x31e   : > { %v1763_v20 = vadd.f32 %v1762_v19, %v1743_v3 }
 0x320   : > { %1765 = vst [vmem:[%s489_s11] sm:$0x3] %v1763_v20 }
 0x321 PF: > { %s3164_s27 = sld [smem:[#allocation17_spill]]  ;;  %s3167_s24 = smov %s2256_s25 }
 0x322   : > { %s3165_s30 = sld [smem:[#allocation16_spill]] }
 0x323   : > { %s3166_s26 = sld [smem:[#allocation18_spill]] }
 0x327   : > { %p26_p8 = scmp.ge.s32.totalorder %s3164_s27, 4  }
 0x328   : > { %s3168_s25 = smov %s3165_s30 }
 0x329   :  { %28 = sbr.rel (!%p26_p8) target bundleno = 14 (0xe), region = 150 }
 0x32e   :  { %1785 = vsyncpa [#allocation3], 1 }
 0x32f   :  { %1787 = vsyncpa [#allocation3 + $0x1], 1 }
 0x330   :  { %1788 = vsyncpa [#allocation5], 1 }
 0x331   :  { %1790 = vsyncpa [#allocation5 + $0x1], 1 }
 0x332   :  { %1791 = vsyncpa [#allocation8], 1 }
 0x333   :  { %1793 = vsyncpa [#allocation8 + $0x1], 1 }
 0x334   :  { %1794 = vsyncpa [#allocation11], 1 }
 0x335   :  { %1796 = vsyncpa [#allocation11 + $0x1], 1 }

</bundles_post_ra>
